<compile_context>
chip_gen: v7x
topology: tpu7x:2x2x1
jax: 0.10.0
libtpu: 0.0.40
codegen_flags: <defaults>
</compile_context>

<pallas_src>
import jax
import jax.numpy as jnp
from jax.experimental import pallas as pl
from jax.experimental.pallas import tpu as pltpu


def _make_dense_layer_kernel(H, W, C_in, C_out, compute_dtype):
    """Build the per-image kernel body (static shapes baked in).

    Refs:
      x_ref  : (1, H, W, C_in)          unpadded NHWC input tile
      w_ref  : (9, C_in, C_out)         conv weight, tap-major layout
      b_ref  : (1, C_out)               conv bias (f32)
      o_ref  : (1, H, W, C_in + C_out)  concat([x, relu(conv(x))], channel)
      xp_scr : (H+2, W+2, C_in)         VMEM scratch: zero-padded input
                                        (compute_dtype)
    """
    taps = [(dy, dx) for dy in range(3) for dx in range(3)]

    def kernel(x_ref, w_ref, b_ref, o_ref, xp_scr):
        x = x_ref[0]                                     # (H, W, C_in), x dtype
        xc = x.astype(compute_dtype)                     # single up-front cast

        # --- zero-pad: border strips only (interior is overwritten) --------
        # Done every grid step: with a "parallel" batch axis each TensorCore
        # owns its own scratch and its first step need not be program_id==0,
        # so a pid==0 gate would be unsafe.  The strips are tiny.
        zrow = jnp.zeros((1, W + 2, C_in), compute_dtype)
        zcol = jnp.zeros((H + 2, 1, C_in), compute_dtype)
        xp_scr[0:1, :, :] = zrow
        xp_scr[H + 1:H + 2, :, :] = zrow
        xp_scr[:, 0:1, :] = zcol
        xp_scr[:, W + 1:W + 2, :] = zcol
        xp_scr[1:H + 1, 1:W + 1, :] = xc                 # interior

        # --- 3x3 SAME conv as 9 accumulating MXU matmuls (no im2col buf) ----
        acc = jnp.zeros((H * W, C_out), jnp.float32)
        for t, (dy, dx) in enumerate(taps):
            tap = xp_scr[dy:dy + H, dx:dx + W, :].reshape(H * W, C_in)
            acc = acc + jnp.dot(tap, w_ref[t],
                                preferred_element_type=jnp.float32)
        acc = acc + b_ref[...]                           # bias in f32
        conv_relu = jnp.maximum(acc, 0.0).reshape(H, W, C_out)

        # --- fused channel-concat store (one masked store, not two) ---------
        o_ref[0] = jnp.concatenate(
            [x.astype(o_ref.dtype), conv_relu.astype(o_ref.dtype)], axis=-1)

    return kernel


def dense_layer_nhwc(x_nhwc, weight_oihw, bias, *, compute_dtype=jnp.bfloat16):
    """DenseLayer forward in NHWC (preferred; chain these to avoid transposes).

    Args:
      x_nhwc:      (N, H, W, C_in)
      weight_oihw: (C_out, C_in, 3, 3)   PyTorch conv weight layout
      bias:        (C_out,)
      compute_dtype: MXU operand dtype (bf16 default; accumulation is f32).
        Pass jnp.float32 for bit-tight parity with the f32 reference.

    Returns:
      (N, H, W, C_in + C_out), dtype of x_nhwc.
    """
    N, H, W, C_in = x_nhwc.shape
    C_out = weight_oihw.shape[0]
    x_dtype = x_nhwc.dtype

    # OIHW -> (ky, kx, I, O) -> (9, C_in, C_out); tap index t = dy*3 + dx
    # matches the kernel's shifted-slice order.  Cast once to the MXU feed
    # dtype so only compute_dtype bytes get DMA'd.
    w9 = jnp.transpose(weight_oihw, (2, 3, 1, 0)).reshape(9, C_in, C_out)
    w9 = w9.astype(compute_dtype)
    b2d = bias.reshape(1, C_out).astype(jnp.float32)

    kernel = _make_dense_layer_kernel(H, W, C_in, C_out, compute_dtype)

    itemsize = jnp.dtype(x_dtype).itemsize
    cost = pl.CostEstimate(
        flops=2 * N * H * W * (9 * C_in) * C_out,
        transcendentals=0,
        bytes_accessed=(N * H * W * C_in * itemsize                      # x in
                        + N * H * W * (C_in + C_out) * itemsize          # out
                        + w9.size * jnp.dtype(compute_dtype).itemsize
                        + b2d.size * 4),
    )

    return pl.pallas_call(
        kernel,
        out_shape=jax.ShapeDtypeStruct((N, H, W, C_in + C_out), x_dtype),
        grid_spec=pltpu.PrefetchScalarGridSpec(
            num_scalar_prefetch=0,
            grid=(N,),
            in_specs=[
                pl.BlockSpec((1, H, W, C_in), lambda n: (n, 0, 0, 0)),
                # Constant index_map: weights/bias fetched once, VMEM-resident
                # across the whole batch grid.
                pl.BlockSpec((9, C_in, C_out), lambda n: (0, 0, 0)),
                pl.BlockSpec((1, C_out), lambda n: (0, 0)),
            ],
            out_specs=pl.BlockSpec(
                (1, H, W, C_in + C_out), lambda n: (n, 0, 0, 0)),
            scratch_shapes=[
                pltpu.VMEM((H + 2, W + 2, C_in), compute_dtype),  # padded input
            ],
        ),
        compiler_params=pltpu.CompilerParams(
            dimension_semantics=("parallel",)),   # batch images -> both TCs on v7x
        cost_estimate=cost,
    )(x_nhwc, w9, b2d)


def dense_layer(x_nchw, weight_oihw, bias, *, compute_dtype=jnp.bfloat16):
    """PyTorch-compatible NCHW wrapper.

    When stacking DenseLayers (as in RDN), call `dense_layer_nhwc` directly and
    keep activations NHWC end-to-end; these two transposes are two full HBM
    passes per layer that only exist to match the NCHW module signature.
    """
    x_nhwc = jnp.transpose(x_nchw, (0, 2, 3, 1))
    out_nhwc = dense_layer_nhwc(
        x_nhwc, weight_oihw, bias, compute_dtype=compute_dtype)
    return jnp.transpose(out_nhwc, (0, 3, 1, 2))


def reference_dense_layer(x_nchw, weight_oihw, bias):
    """Pure-JAX reference (lax conv), for correctness checking."""
    conv = jax.lax.conv_general_dilated(
        x_nchw, weight_oihw,
        window_strides=(1, 1), padding="SAME",
        dimension_numbers=("NCHW", "OIHW", "NCHW"),
    ) + bias.reshape(1, -1, 1, 1)
    return jnp.concatenate([x_nchw, jnp.maximum(conv, 0.0)], axis=1)


if __name__ == "__main__":
    N, C_in, H, W = 2, 4, 16, 16
    C_out = 8

    key = jax.random.PRNGKey(0)
    kx, kw, kb = jax.random.split(key, 3)
    x = jax.random.normal(kx, (N, C_in, H, W), dtype=jnp.float32)
    weight = jax.random.normal(kw, (C_out, C_in, 3, 3), dtype=jnp.float32) * 0.1
    bias = jax.random.normal(kb, (C_out,), dtype=jnp.float32) * 0.1

    ref = jax.block_until_ready(reference_dense_layer(x, weight, bias))

    # f32 compute path: tight tolerance vs the reference.
    fwd_f32 = jax.jit(
        lambda a, w, b: dense_layer(a, w, b, compute_dtype=jnp.float32))
    out_f32 = jax.block_until_ready(fwd_f32(x, weight, bias))
    assert out_f32.shape == (N, C_in + C_out, H, W), out_f32.shape
    assert jnp.allclose(out_f32, ref, atol=1e-5, rtol=1e-5), "f32 mismatch"

    # bf16 MXU-feed path (production default): loose tolerance.
    fwd_bf16 = jax.jit(dense_layer)
    out_bf16 = jax.block_until_ready(fwd_bf16(x, weight, bias))
    assert out_bf16.shape == (N, C_in + C_out, H, W), out_bf16.shape
    assert jnp.allclose(out_bf16, ref, atol=5e-2, rtol=5e-2), "bf16 mismatch"

    print("KERNEL_OK")
</pallas_src>

<mosaic_0001>
module attributes {stable_mosaic.version = 11 : i64} {
  func.func @kernel(%arg0: i32, %arg1: memref<1x16x16x4xf32, #tpu.memory_space<vmem>>, %arg2: memref<9x4x8xf32, #tpu.memory_space<vmem>>, %arg3: memref<1x8xf32, #tpu.memory_space<vmem>>, %arg4: memref<1x16x16x12xf32, #tpu.memory_space<vmem>>, %arg5: memref<18x18x4xf32, #tpu.memory_space<vmem>>) attributes {dimension_semantics = [#tpu.dimension_semantics<parallel>], iteration_bounds = array<i64: 2>, scalar_prefetch = 0 : i64, scratch_operands = 1 : i64, tpu.core_type = #tpu.core_type<tc>, window_params = [{transform_indices = @transform_0, window_bounds = array<i64: 1, 16, 16, 4>}, {pipeline_mode = #tpu.pipeline_mode<synchronous>, transform_indices = @transform_1, window_bounds = array<i64: 9, 4, 8>}, {pipeline_mode = #tpu.pipeline_mode<synchronous>, transform_indices = @transform_2, window_bounds = array<i64: 1, 8>}, {transform_indices = @transform_3, window_bounds = array<i64: 1, 16, 16, 12>}]} {
    %c0 = arith.constant 0 : index
    %c0_0 = arith.constant 0 : index
    %c0_1 = arith.constant 0 : index
    %c0_2 = arith.constant 0 : index
    %0 = vector.load %arg1[%c0, %c0_0, %c0_1, %c0_2] : memref<1x16x16x4xf32, #tpu.memory_space<vmem>>, vector<1x16x16x4xf32>
    %1 = vector.shape_cast %0 : vector<1x16x16x4xf32> to vector<16x16x4xf32>
    %cst = arith.constant 0.000000e+00 : f32
    %2 = vector.broadcast %cst : f32 to vector<1x18x4xf32>
    %cst_3 = arith.constant 0.000000e+00 : f32
    %3 = vector.broadcast %cst_3 : f32 to vector<18x1x4xf32>
    %c0_4 = arith.constant 0 : index
    %c0_5 = arith.constant 0 : index
    %c0_6 = arith.constant 0 : index
    %4 = vector.load %arg5[%c0_4, %c0_5, %c0_6] : memref<18x18x4xf32, #tpu.memory_space<vmem>>, vector<1x18x4xf32>
    tpu.vector_store %arg5[%c0_4, %c0_5, %c0_6], %2 {strides = array<i32>} : memref<18x18x4xf32, #tpu.memory_space<vmem>>, vector<1x18x4xf32>,
    %c17 = arith.constant 17 : index
    %c0_7 = arith.constant 0 : index
    %c0_8 = arith.constant 0 : index
    %5 = vector.load %arg5[%c17, %c0_7, %c0_8] : memref<18x18x4xf32, #tpu.memory_space<vmem>>, vector<1x18x4xf32>
    tpu.vector_store %arg5[%c17, %c0_7, %c0_8], %2 {strides = array<i32>} : memref<18x18x4xf32, #tpu.memory_space<vmem>>, vector<1x18x4xf32>,
    %c0_9 = arith.constant 0 : index
    %c0_10 = arith.constant 0 : index
    %c0_11 = arith.constant 0 : index
    %6 = vector.load %arg5[%c0_9, %c0_10, %c0_11] : memref<18x18x4xf32, #tpu.memory_space<vmem>>, vector<18x1x4xf32>
    tpu.vector_store %arg5[%c0_9, %c0_10, %c0_11], %3 {strides = array<i32>} : memref<18x18x4xf32, #tpu.memory_space<vmem>>, vector<18x1x4xf32>,
    %c0_12 = arith.constant 0 : index
    %c17_13 = arith.constant 17 : index
    %c0_14 = arith.constant 0 : index
    %7 = vector.load %arg5[%c0_12, %c17_13, %c0_14] : memref<18x18x4xf32, #tpu.memory_space<vmem>>, vector<18x1x4xf32>
    tpu.vector_store %arg5[%c0_12, %c17_13, %c0_14], %3 {strides = array<i32>} : memref<18x18x4xf32, #tpu.memory_space<vmem>>, vector<18x1x4xf32>,
    %c1 = arith.constant 1 : index
    %c1_15 = arith.constant 1 : index
    %c0_16 = arith.constant 0 : index
    %8 = vector.load %arg5[%c1, %c1_15, %c0_16] : memref<18x18x4xf32, #tpu.memory_space<vmem>>, vector<16x16x4xf32>
    tpu.vector_store %arg5[%c1, %c1_15, %c0_16], %1 {strides = array<i32>} : memref<18x18x4xf32, #tpu.memory_space<vmem>>, vector<16x16x4xf32>,
    %cst_17 = arith.constant 0.000000e+00 : f32
    %9 = vector.broadcast %cst_17 : f32 to vector<256x8xf32>
    %c0_18 = arith.constant 0 : index
    %c0_19 = arith.constant 0 : index
    %c0_20 = arith.constant 0 : index
    %10 = vector.load %arg5[%c0_18, %c0_19, %c0_20] : memref<18x18x4xf32, #tpu.memory_space<vmem>>, vector<16x16x4xf32>
    %11 = vector.shape_cast %10 : vector<16x16x4xf32> to vector<256x4xf32>
    %c0_21 = arith.constant 0 : index
    %c0_22 = arith.constant 0 : index
    %c0_23 = arith.constant 0 : index
    %12 = vector.load %arg2[%c0_21, %c0_22, %c0_23] : memref<9x4x8xf32, #tpu.memory_space<vmem>>, vector<1x4x8xf32>
    %13 = vector.shape_cast %12 : vector<1x4x8xf32> to vector<4x8xf32>
    %cst_24 = arith.constant dense<0.000000e+00> : vector<256x8xf32>
    %14 = tpu.matmul %11, %13, %cst_24 {dimension_numbers = #tpu.dot_dimension_numbers<[1], [0], [0], [1], [0, 0, 1, 1], [], []>} : vector<256x4xf32>, vector<4x8xf32>, vector<256x8xf32> -> vector<256x8xf32>
    %15 = arith.addf %9, %14 : vector<256x8xf32>
    %c0_25 = arith.constant 0 : index
    %c1_26 = arith.constant 1 : index
    %c0_27 = arith.constant 0 : index
    %16 = vector.load %arg5[%c0_25, %c1_26, %c0_27] : memref<18x18x4xf32, #tpu.memory_space<vmem>>, vector<16x16x4xf32>
    %17 = vector.shape_cast %16 : vector<16x16x4xf32> to vector<256x4xf32>
    %c1_28 = arith.constant 1 : index
    %c0_29 = arith.constant 0 : index
    %c0_30 = arith.constant 0 : index
    %18 = vector.load %arg2[%c1_28, %c0_29, %c0_30] : memref<9x4x8xf32, #tpu.memory_space<vmem>>, vector<1x4x8xf32>
    %19 = vector.shape_cast %18 : vector<1x4x8xf32> to vector<4x8xf32>
    %cst_31 = arith.constant dense<0.000000e+00> : vector<256x8xf32>
    %20 = tpu.matmul %17, %19, %cst_31 {dimension_numbers = #tpu.dot_dimension_numbers<[1], [0], [0], [1], [0, 0, 1, 1], [], []>} : vector<256x4xf32>, vector<4x8xf32>, vector<256x8xf32> -> vector<256x8xf32>
    %21 = arith.addf %15, %20 : vector<256x8xf32>
    %c0_32 = arith.constant 0 : index
    %c2 = arith.constant 2 : index
    %c0_33 = arith.constant 0 : index
    %22 = vector.load %arg5[%c0_32, %c2, %c0_33] : memref<18x18x4xf32, #tpu.memory_space<vmem>>, vector<16x16x4xf32>
    %23 = vector.shape_cast %22 : vector<16x16x4xf32> to vector<256x4xf32>
    %c2_34 = arith.constant 2 : index
    %c0_35 = arith.constant 0 : index
    %c0_36 = arith.constant 0 : index
    %24 = vector.load %arg2[%c2_34, %c0_35, %c0_36] : memref<9x4x8xf32, #tpu.memory_space<vmem>>, vector<1x4x8xf32>
    %25 = vector.shape_cast %24 : vector<1x4x8xf32> to vector<4x8xf32>
    %cst_37 = arith.constant dense<0.000000e+00> : vector<256x8xf32>
    %26 = tpu.matmul %23, %25, %cst_37 {dimension_numbers = #tpu.dot_dimension_numbers<[1], [0], [0], [1], [0, 0, 1, 1], [], []>} : vector<256x4xf32>, vector<4x8xf32>, vector<256x8xf32> -> vector<256x8xf32>
    %27 = arith.addf %21, %26 : vector<256x8xf32>
    %c1_38 = arith.constant 1 : index
    %c0_39 = arith.constant 0 : index
    %c0_40 = arith.constant 0 : index
    %28 = vector.load %arg5[%c1_38, %c0_39, %c0_40] : memref<18x18x4xf32, #tpu.memory_space<vmem>>, vector<16x16x4xf32>
    %29 = vector.shape_cast %28 : vector<16x16x4xf32> to vector<256x4xf32>
    %c3 = arith.constant 3 : index
    %c0_41 = arith.constant 0 : index
    %c0_42 = arith.constant 0 : index
    %30 = vector.load %arg2[%c3, %c0_41, %c0_42] : memref<9x4x8xf32, #tpu.memory_space<vmem>>, vector<1x4x8xf32>
    %31 = vector.shape_cast %30 : vector<1x4x8xf32> to vector<4x8xf32>
    %cst_43 = arith.constant dense<0.000000e+00> : vector<256x8xf32>
    %32 = tpu.matmul %29, %31, %cst_43 {dimension_numbers = #tpu.dot_dimension_numbers<[1], [0], [0], [1], [0, 0, 1, 1], [], []>} : vector<256x4xf32>, vector<4x8xf32>, vector<256x8xf32> -> vector<256x8xf32>
    %33 = arith.addf %27, %32 : vector<256x8xf32>
    %c1_44 = arith.constant 1 : index
    %c1_45 = arith.constant 1 : index
    %c0_46 = arith.constant 0 : index
    %34 = vector.load %arg5[%c1_44, %c1_45, %c0_46] : memref<18x18x4xf32, #tpu.memory_space<vmem>>, vector<16x16x4xf32>
    %35 = vector.shape_cast %34 : vector<16x16x4xf32> to vector<256x4xf32>
    %c4 = arith.constant 4 : index
    %c0_47 = arith.constant 0 : index
    %c0_48 = arith.constant 0 : index
    %36 = vector.load %arg2[%c4, %c0_47, %c0_48] : memref<9x4x8xf32, #tpu.memory_space<vmem>>, vector<1x4x8xf32>
    %37 = vector.shape_cast %36 : vector<1x4x8xf32> to vector<4x8xf32>
    %cst_49 = arith.constant dense<0.000000e+00> : vector<256x8xf32>
    %38 = tpu.matmul %35, %37, %cst_49 {dimension_numbers = #tpu.dot_dimension_numbers<[1], [0], [0], [1], [0, 0, 1, 1], [], []>} : vector<256x4xf32>, vector<4x8xf32>, vector<256x8xf32> -> vector<256x8xf32>
    %39 = arith.addf %33, %38 : vector<256x8xf32>
    %c1_50 = arith.constant 1 : index
    %c2_51 = arith.constant 2 : index
    %c0_52 = arith.constant 0 : index
    %40 = vector.load %arg5[%c1_50, %c2_51, %c0_52] : memref<18x18x4xf32, #tpu.memory_space<vmem>>, vector<16x16x4xf32>
    %41 = vector.shape_cast %40 : vector<16x16x4xf32> to vector<256x4xf32>
    %c5 = arith.constant 5 : index
    %c0_53 = arith.constant 0 : index
    %c0_54 = arith.constant 0 : index
    %42 = vector.load %arg2[%c5, %c0_53, %c0_54] : memref<9x4x8xf32, #tpu.memory_space<vmem>>, vector<1x4x8xf32>
    %43 = vector.shape_cast %42 : vector<1x4x8xf32> to vector<4x8xf32>
    %cst_55 = arith.constant dense<0.000000e+00> : vector<256x8xf32>
    %44 = tpu.matmul %41, %43, %cst_55 {dimension_numbers = #tpu.dot_dimension_numbers<[1], [0], [0], [1], [0, 0, 1, 1], [], []>} : vector<256x4xf32>, vector<4x8xf32>, vector<256x8xf32> -> vector<256x8xf32>
    %45 = arith.addf %39, %44 : vector<256x8xf32>
    %c2_56 = arith.constant 2 : index
    %c0_57 = arith.constant 0 : index
    %c0_58 = arith.constant 0 : index
    %46 = vector.load %arg5[%c2_56, %c0_57, %c0_58] : memref<18x18x4xf32, #tpu.memory_space<vmem>>, vector<16x16x4xf32>
    %47 = vector.shape_cast %46 : vector<16x16x4xf32> to vector<256x4xf32>
    %c6 = arith.constant 6 : index
    %c0_59 = arith.constant 0 : index
    %c0_60 = arith.constant 0 : index
    %48 = vector.load %arg2[%c6, %c0_59, %c0_60] : memref<9x4x8xf32, #tpu.memory_space<vmem>>, vector<1x4x8xf32>
    %49 = vector.shape_cast %48 : vector<1x4x8xf32> to vector<4x8xf32>
    %cst_61 = arith.constant dense<0.000000e+00> : vector<256x8xf32>
    %50 = tpu.matmul %47, %49, %cst_61 {dimension_numbers = #tpu.dot_dimension_numbers<[1], [0], [0], [1], [0, 0, 1, 1], [], []>} : vector<256x4xf32>, vector<4x8xf32>, vector<256x8xf32> -> vector<256x8xf32>
    %51 = arith.addf %45, %50 : vector<256x8xf32>
    %c2_62 = arith.constant 2 : index
    %c1_63 = arith.constant 1 : index
    %c0_64 = arith.constant 0 : index
    %52 = vector.load %arg5[%c2_62, %c1_63, %c0_64] : memref<18x18x4xf32, #tpu.memory_space<vmem>>, vector<16x16x4xf32>
    %53 = vector.shape_cast %52 : vector<16x16x4xf32> to vector<256x4xf32>
    %c7 = arith.constant 7 : index
    %c0_65 = arith.constant 0 : index
    %c0_66 = arith.constant 0 : index
    %54 = vector.load %arg2[%c7, %c0_65, %c0_66] : memref<9x4x8xf32, #tpu.memory_space<vmem>>, vector<1x4x8xf32>
    %55 = vector.shape_cast %54 : vector<1x4x8xf32> to vector<4x8xf32>
    %cst_67 = arith.constant dense<0.000000e+00> : vector<256x8xf32>
    %56 = tpu.matmul %53, %55, %cst_67 {dimension_numbers = #tpu.dot_dimension_numbers<[1], [0], [0], [1], [0, 0, 1, 1], [], []>} : vector<256x4xf32>, vector<4x8xf32>, vector<256x8xf32> -> vector<256x8xf32>
    %57 = arith.addf %51, %56 : vector<256x8xf32>
    %c2_68 = arith.constant 2 : index
    %c2_69 = arith.constant 2 : index
    %c0_70 = arith.constant 0 : index
    %58 = vector.load %arg5[%c2_68, %c2_69, %c0_70] : memref<18x18x4xf32, #tpu.memory_space<vmem>>, vector<16x16x4xf32>
    %59 = vector.shape_cast %58 : vector<16x16x4xf32> to vector<256x4xf32>
    %c8 = arith.constant 8 : index
    %c0_71 = arith.constant 0 : index
    %c0_72 = arith.constant 0 : index
    %60 = vector.load %arg2[%c8, %c0_71, %c0_72] : memref<9x4x8xf32, #tpu.memory_space<vmem>>, vector<1x4x8xf32>
    %61 = vector.shape_cast %60 : vector<1x4x8xf32> to vector<4x8xf32>
    %cst_73 = arith.constant dense<0.000000e+00> : vector<256x8xf32>
    %62 = tpu.matmul %59, %61, %cst_73 {dimension_numbers = #tpu.dot_dimension_numbers<[1], [0], [0], [1], [0, 0, 1, 1], [], []>} : vector<256x4xf32>, vector<4x8xf32>, vector<256x8xf32> -> vector<256x8xf32>
    %63 = arith.addf %57, %62 : vector<256x8xf32>
    %c0_74 = arith.constant 0 : index
    %c0_75 = arith.constant 0 : index
    %64 = vector.load %arg3[%c0_74, %c0_75] : memref<1x8xf32, #tpu.memory_space<vmem>>, vector<1x8xf32>
    %65 = vector.broadcast %64 : vector<1x8xf32> to vector<256x8xf32>
    %66 = arith.addf %63, %65 : vector<256x8xf32>
    %cst_76 = arith.constant 0.000000e+00 : f32
    %67 = vector.broadcast %cst_76 : f32 to vector<256x8xf32>
    %68 = arith.maximumf %66, %67 : vector<256x8xf32>
    %69 = vector.shape_cast %68 : vector<256x8xf32> to vector<16x16x8xf32>
    %70 = tpu.concatenate %1, %69 in 2 : vector<16x16x4xf32>, vector<16x16x8xf32> -> vector<16x16x12xf32>
    %c0_77 = arith.constant 0 : index
    %c0_78 = arith.constant 0 : index
    %c0_79 = arith.constant 0 : index
    %c0_80 = arith.constant 0 : index
    %71 = vector.load %arg4[%c0_77, %c0_78, %c0_79, %c0_80] : memref<1x16x16x12xf32, #tpu.memory_space<vmem>>, vector<1x16x16x12xf32>
    %72 = vector.shape_cast %71 : vector<1x16x16x12xf32> to vector<16x16x12xf32>
    %73 = vector.shape_cast %70 : vector<16x16x12xf32> to vector<1x16x16x12xf32>
    tpu.vector_store %arg4[%c0_77, %c0_78, %c0_79, %c0_80], %73 {strides = array<i32>} : memref<1x16x16x12xf32, #tpu.memory_space<vmem>>, vector<1x16x16x12xf32>,
    return
  }
  func.func @transform_0(%arg0: i32) -> (i32, i32, i32, i32) {
    %c0_i32 = arith.constant 0 : i32
    %c0_i32_0 = arith.constant 0 : i32
    %c0_i32_1 = arith.constant 0 : i32
    %c0_i32_2 = arith.constant 0 : i32
    return %arg0, %c0_i32, %c0_i32_0, %c0_i32_1 : i32, i32, i32, i32
  }
  func.func @transform_1(%arg0: i32) -> (i32, i32, i32) {
    %c0_i32 = arith.constant 0 : i32
    %c0_i32_0 = arith.constant 0 : i32
    %c0_i32_1 = arith.constant 0 : i32
    %c0_i32_2 = arith.constant 0 : i32
    return %c0_i32, %c0_i32_0, %c0_i32_1 : i32, i32, i32
  }
  func.func @transform_2(%arg0: i32) -> (i32, i32) {
    %c0_i32 = arith.constant 0 : i32
    %c0_i32_0 = arith.constant 0 : i32
    %c0_i32_1 = arith.constant 0 : i32
    return %c0_i32, %c0_i32_0 : i32, i32
  }
  func.func @transform_3(%arg0: i32) -> (i32, i32, i32, i32) {
    %c0_i32 = arith.constant 0 : i32
    %c0_i32_0 = arith.constant 0 : i32
    %c0_i32_1 = arith.constant 0 : i32
    %c0_i32_2 = arith.constant 0 : i32
    return %arg0, %c0_i32, %c0_i32_0, %c0_i32_1 : i32, i32, i32, i32
  }
}

</mosaic_0001>

<bundles_post_ra>
// kernel: _lambda_.1
= control target key start
LH: loop header
LB: loop body
LE: loop exit
PB: predicated region body
PF: predicated region fallthrough
CT: control target
= control target key end

     0   :  { %s5412_s12 = smov 0   ;;  %s6681_s0 = inlined_call_operand.vmem [shape: f32[2,16,16,4], index: 0, kind: input, shape index: {}]   ;;  %s6682_s1 = inlined_call_operand.vmem [shape: f32[9,4,8], index: 1, kind: input, shape index: {}]   ;;  %s6683_s2 = inlined_call_operand.vmem [shape: f32[1,8], index: 2, kind: input, shape index: {}]   ;;  %s6684_s3 = inlined_call_operand.vmem [shape: f32[2,16,16,12], index: 3, kind: output, shape index: {}]  }
   0x1 LB: > { %s4048_s13 = sadd.s32 4294967295, %s5388_s12   ;;  %p4052_p0 = scmp.ge.s32.totalorder %s5388_s12, 1  ;;  %s5388_s12 = sphi %s5412_s12, %s13_s12  }
   0x2   : > { %p137_p1 = scmp.lt.s32.totalorder %s5388_s12, 3 }
   0x4   : > { %p138_p2 = pnand %p4052_p0, %p137_p1 }
   0x6   : > { %141 = sbr.rel (%p138_p2) target bundleno = 668 (0x29c), region = 32 }
   0xd   : > { %v4057_v0 = vld [vmem:[%s6682_s1 + $0x4] sm:$0xf]  ;;  %vm445_vm0 = vcmask 1043456   ;;  %vm203_vm1 = vcmask 31744   ;;  %vm206_vm2 = vcmask 25600   ;;  %v5390_v1 = vmov 0.0  }
   0xe   : > { %4664 = vmatprep.subr.msk.mxu1 %vm445_vm0, %v4057_v0  ;;  %204 = vst.msk [vmem:[#allocation2] sm:$0xff] %vm203_vm1, %v5390_v1  ;;  %205 = vst.msk [vmem:[#allocation2 + $0x8] sm:$0xff] %vm203_vm1, %v5390_v1  ;;  %vm212_vm3 = vcmask 24576   ;;  %v5431_v2 = vld [vmem:[%s6682_s1 + $0x10] sm:$0xf]  ;;  %p5435_p3 = scmp.lt.s32.totalorder %s4048_s13, 1 }
   0xf   : > { %209 = vst.msk [vmem:[#allocation2 + $0x198] sm:$0xff] %vm203_vm1, %v5390_v1  ;;  %210 = vst.msk [vmem:[#allocation2 + $0x1a0] sm:$0xff] %vm203_vm1, %v5390_v1  ;;  %v5442_v3 = vld [vmem:[%s6682_s1 + $0x14] sm:$0xf]  ;;  %4665 = vmatpush3.msk.msra.mxu1 %vm445_vm0, %v4057_v0  ;;  %4864 = vmatprep.subr.msk.mxu0 %vm445_vm0, %v5431_v2  ;;  %v314_v4 = vld [vmem:[%s6682_s1] sm:$0xf] }
  0x10   : > { %207 = vst.msk [vmem:[#allocation2 + $0x10] sm:$0x3] %vm206_vm2, %v5390_v1  ;;  %211 = vst.msk [vmem:[#allocation2 + $0x1a8] sm:$0x3] %vm206_vm2, %v5390_v1  ;;  %4865 = vmatpush3.msk.msra.mxu0 %vm445_vm0, %v5431_v2  ;;  %s6891_s13 = smov (!%p5435_p3, %s4048_s13), 1  ;;  %4714 = vmatprep.subr.msk.mxu1 %vm445_vm0, %v314_v4  ;;  %s5391_s14 = smov 4  }
  0x11   : > { %231 = vst.msk [vmem:[#allocation2 + $0x11] sm:$0x1] %vm212_vm3, %v5390_v1  ;;  %213 = vst.msk [vmem:[#allocation2] sm:$0x1] %vm212_vm3, %v5390_v1  ;;  %4914 = vmatprep.subr.msk.mxu0 %vm445_vm0, %v5442_v3  ;;  %s4365_s23 = sshll.u32 %s6891_s13, 8  ;;  %vm3960_vm4 = vcmask 97280  }
  0x12   : > { %214 = vst.msk [vmem:[#allocation2 + $0x18] sm:$0x1] %vm212_vm3, %v5390_v1  ;;  %215 = vst.msk [vmem:[#allocation2 + $0x30] sm:$0x1] %vm212_vm3, %v5390_v1  ;;  %s5503_s26 = scalar_lea.vmem %s6681_s0, %s4365_s23  ;;  %v5517_v8 = vld [vmem:[%s6682_s1 + $0x8] sm:$0xf]  ;;  %s6548_s17 = scalar_lea.vmem %s6684_s3, %s4365_s23 }
  0x13   : > { %216 = vst.msk [vmem:[#allocation2 + $0x48] sm:$0x1] %vm212_vm3, %v5390_v1  ;;  %217 = vst.msk [vmem:[#allocation2 + $0x60] sm:$0x1] %vm212_vm3, %v5390_v1  ;;  %v5506_v5 = vld [vmem:[%s5503_s26] sm:$0xff]  ;;  %v5509_v6 = vld [vmem:[%s5503_s26 + $0x8] sm:$0xff] }
  0x14   : > { %218 = vst.msk [vmem:[#allocation2 + $0x78] sm:$0x1] %vm212_vm3, %v5390_v1  ;;  %219 = vst.msk [vmem:[#allocation2 + $0x90] sm:$0x1] %vm212_vm3, %v5390_v1  ;;  %v5512_v7 = vld [vmem:[%s5503_s26 + $0x10] sm:$0xff]  ;;  %v5526_v11 = vld [vmem:[%s5503_s26 + $0x18] sm:$0xff] }
  0x15   : > { %220 = vst.msk [vmem:[#allocation2 + $0xa8] sm:$0x1] %vm212_vm3, %v5390_v1  ;;  %221 = vst.msk [vmem:[#allocation2 + $0xc0] sm:$0x1] %vm212_vm3, %v5390_v1  ;;  %v315_v9 = vld [vmem:[#allocation2 + $0x1] sm:$0xff]  ;;  %v5538_v14 = vld [vmem:[%s5503_s26 + $0x30] sm:$0xff] }
  0x16   : > { %222 = vst.msk [vmem:[#allocation2 + $0xd8] sm:$0x1] %vm212_vm3, %v5390_v1  ;;  %223 = vst.msk [vmem:[#allocation2 + $0xf0] sm:$0x1] %vm212_vm3, %v5390_v1  ;;  %4666 = vmatprep.mubr.msk.f32.mxu1 %vm203_vm1, %v315_v9  ;;  %v5532_v12 = vld [vmem:[%s5503_s26 + $0x20] sm:$0xff]  ;;  %v5535_v13 = vld [vmem:[%s5503_s26 + $0x28] sm:$0xff] }
  0x17   : > { %224 = vst.msk [vmem:[#allocation2 + $0x108] sm:$0x1] %vm212_vm3, %v5390_v1  ;;  %225 = vst.msk [vmem:[#allocation2 + $0x120] sm:$0x1] %vm212_vm3, %v5390_v1  ;;  %v316_v10 = vld [vmem:[#allocation2 + $0x9] sm:$0xff]  ;;  %v5548_v15 = vld [vmem:[%s5503_s26 + $0x38] sm:$0xff] }
  0x18   : > { %226 = vst.msk [vmem:[#allocation2 + $0x138] sm:$0x1] %vm212_vm3, %v5390_v1  ;;  %227 = vst.msk [vmem:[#allocation2 + $0x150] sm:$0x1] %vm212_vm3, %v5390_v1  ;;  %4667 = vmatmul.mubr.msk.f32.vlgmr.msra.gmra.mrb[0].mxu1 %vm203_vm1, %v316_v10  ;;  %v5551_v16 = vld [vmem:[%s5503_s26 + $0x40] sm:$0xff]  ;;  %v5554_v17 = vld [vmem:[%s5503_s26 + $0x48] sm:$0xff] }
  0x19   : > { %228 = vst.msk [vmem:[#allocation2 + $0x168] sm:$0x1] %vm212_vm3, %v5390_v1  ;;  %229 = vst.msk [vmem:[#allocation2 + $0x180] sm:$0x1] %vm212_vm3, %v5390_v1  ;;  %4715 = vmatpush3.msk.msra.mxu1 %vm445_vm0, %v314_v4  ;;  %v5564_v18 = vld [vmem:[%s5503_s26 + $0x50] sm:$0xff]  ;;  %v5567_v19 = vld [vmem:[%s5503_s26 + $0x58] sm:$0xff] }
  0x1a   : > { %230 = vst.msk [vmem:[#allocation2 + $0x198] sm:$0x1] %vm212_vm3, %v5390_v1  ;;  %232 = vst.msk [vmem:[#allocation2 + $0x29] sm:$0x1] %vm212_vm3, %v5390_v1  ;;  %v5570_v20 = vld [vmem:[%s5503_s26 + $0x60] sm:$0xff]  ;;  %v5579_v21 = vld [vmem:[%s5503_s26 + $0x68] sm:$0xff]  ;;  %4764 = vmatprep.subr.msk.mxu1 %vm445_vm0, %v5517_v8 }
  0x1b   : > { %233 = vst.msk [vmem:[#allocation2 + $0x41] sm:$0x1] %vm212_vm3, %v5390_v1  ;;  %234 = vst.msk [vmem:[#allocation2 + $0x59] sm:$0x1] %vm212_vm3, %v5390_v1  ;;  %v5582_v22 = vld [vmem:[%s5503_s26 + $0x70] sm:$0xff]  ;;  %v5585_v23 = vld [vmem:[%s5503_s26 + $0x78] sm:$0xff] }
  0x1c   : > { %235 = vst.msk [vmem:[#allocation2 + $0x71] sm:$0x1] %vm212_vm3, %v5390_v1  ;;  %236 = vst.msk [vmem:[#allocation2 + $0x89] sm:$0x1] %vm212_vm3, %v5390_v1  ;;  %v5596_v24 = vld [vmem:[%s5503_s26 + $0x80] sm:$0xff]  ;;  %v5599_v25 = vld [vmem:[%s5503_s26 + $0x88] sm:$0xff] }
  0x1d   : > { %237 = vst.msk [vmem:[#allocation2 + $0xa1] sm:$0x1] %vm212_vm3, %v5390_v1  ;;  %238 = vst.msk [vmem:[#allocation2 + $0xb9] sm:$0x1] %vm212_vm3, %v5390_v1  ;;  %v5602_v26 = vld [vmem:[%s5503_s26 + $0x90] sm:$0xff]  ;;  %v5611_v27 = vld [vmem:[%s5503_s26 + $0x98] sm:$0xff] }
  0x1e   : > { %239 = vst.msk [vmem:[#allocation2 + $0xd1] sm:$0x1] %vm212_vm3, %v5390_v1  ;;  %240 = vst.msk [vmem:[#allocation2 + $0xe9] sm:$0x1] %vm212_vm3, %v5390_v1  ;;  %v5614_v28 = vld [vmem:[%s5503_s26 + $0xa0] sm:$0xff]  ;;  %v5617_v29 = vld [vmem:[%s5503_s26 + $0xa8] sm:$0xff] }
  0x1f   : > { %241 = vst.msk [vmem:[#allocation2 + $0x101] sm:$0x1] %vm212_vm3, %v5390_v1  ;;  %242 = vst.msk [vmem:[#allocation2 + $0x119] sm:$0x1] %vm212_vm3, %v5390_v1  ;;  %v5632_v33 = vld [vmem:[%s6682_s1 + $0x18] sm:$0xf] }
  0x20   : > { %243 = vst.msk [vmem:[#allocation2 + $0x131] sm:$0x1] %vm212_vm3, %v5390_v1  ;;  %244 = vst.msk [vmem:[#allocation2 + $0x149] sm:$0x1] %vm212_vm3, %v5390_v1  ;;  %v5661_v38 = vld [vmem:[%s5503_s26 + $0xb0] sm:$0xff]  ;;  %v5670_v39 = vld [vmem:[%s5503_s26 + $0xb8] sm:$0xff] }
  0x21   : > { %245 = vst.msk [vmem:[#allocation2 + $0x161] sm:$0x1] %vm212_vm3, %v5390_v1  ;;  %246 = vst.msk [vmem:[#allocation2 + $0x179] sm:$0x1] %vm212_vm3, %v5390_v1  ;;  %v5673_v40 = vld [vmem:[%s5503_s26 + $0xc0] sm:$0xff]  ;;  %v5686_v42 = vld [vmem:[%s5503_s26 + $0xc8] sm:$0xff] }
  0x22   : > { %247 = vst.msk [vmem:[#allocation2 + $0x191] sm:$0x1] %vm212_vm3, %v5390_v1  ;;  %248 = vst.msk [vmem:[#allocation2 + $0x1a9] sm:$0x1] %vm212_vm3, %v5390_v1  ;;  %v5693_v44 = vld [vmem:[%s5503_s26 + $0xd0] sm:$0xff]  ;;  %v5696_v45 = vld [vmem:[%s5503_s26 + $0xd8] sm:$0xff] }
  0x23   : > { %6764 = vst [vmem:[#allocation3_spill] sm:$0xff] %v5506_v5  ;;  %6765 = vst [vmem:[#allocation4_spill] sm:$0xff] %v5509_v6  ;;  %v5703_v46 = vld [vmem:[%s5503_s26 + $0xe0] sm:$0xff]  ;;  %v5712_v47 = vld [vmem:[%s5503_s26 + $0xe8] sm:$0xff] }
  0x24   : > { %6766 = vst [vmem:[#allocation5_spill] sm:$0xff] %v5512_v7  ;;  %250 = vst.msk [vmem:[#allocation2 + $0x19] sm:$0xff] %vm203_vm1, %v5506_v5  ;;  %v5763_v57 = vld [vmem:[%s5503_s26 + $0xf0] sm:$0xff]  ;;  %v5766_v58 = vld [vmem:[%s5503_s26 + $0xf8] sm:$0xff] }
  0x25   : > { %251 = vst.msk [vmem:[#allocation2 + $0x21] sm:$0xff] %vm203_vm1, %v5509_v6  ;;  %252 = vst.msk [vmem:[#allocation2 + $0x31] sm:$0xff] %vm203_vm1, %v5512_v7  ;;  %v5791_v63 = vld [vmem:[%s6682_s1 + $0x1c] sm:$0xf] }
  0x26   : > { %6767 = vst [vmem:[#allocation6_spill] sm:$0xff] %v5526_v11  ;;  %253 = vst.msk [vmem:[#allocation2 + $0x39] sm:$0xff] %vm203_vm1, %v5526_v11 }
  0x27   : > { %6768 = vst [vmem:[#allocation7_spill] sm:$0xff] %v5532_v12  ;;  %6769 = vst [vmem:[#allocation8_spill] sm:$0xff] %v5535_v13 }
  0x28   : > { %6770 = vst [vmem:[#allocation9_spill] sm:$0xff] %v5538_v14  ;;  %254 = vst.msk [vmem:[#allocation2 + $0x49] sm:$0xff] %vm203_vm1, %v5532_v12 }
  0x29   : > { %255 = vst.msk [vmem:[#allocation2 + $0x51] sm:$0xff] %vm203_vm1, %v5535_v13  ;;  %256 = vst.msk [vmem:[#allocation2 + $0x61] sm:$0xff] %vm203_vm1, %v5538_v14 }
  0x2a   : > { %6771 = vst [vmem:[#allocation10_spill] sm:$0xff] %v5548_v15  ;;  %6772 = vst [vmem:[#allocation11_spill] sm:$0xff] %v5551_v16 }
  0x2b   : > { %6773 = vst [vmem:[#allocation12_spill] sm:$0xff] %v5554_v17  ;;  %257 = vst.msk [vmem:[#allocation2 + $0x69] sm:$0xff] %vm203_vm1, %v5548_v15  ;;  %v317_v30 = vld [vmem:[#allocation2 + $0x19] sm:$0xff] }
  0x2c   : > { %258 = vst.msk [vmem:[#allocation2 + $0x79] sm:$0xff] %vm203_vm1, %v5551_v16  ;;  %259 = vst.msk [vmem:[#allocation2 + $0x81] sm:$0xff] %vm203_vm1, %v5554_v17  ;;  %v318_v31 = vld [vmem:[#allocation2 + $0x21] sm:$0xff]  ;;  %v5619_v32 = vld [vmem:[#allocation2 + $0x31] sm:$0xff]  ;;  %4669 = vmatprep.mubr.msk.f32.mxu1 %vm203_vm1, %v317_v30  ;;  %4866 = vmatprep.mubr.msk.f32.mxu0 %vm203_vm1, %v317_v30 }
  0x2d   : > { %6774 = vst [vmem:[#allocation13_spill] sm:$0xff] %v5564_v18  ;;  %6775 = vst [vmem:[#allocation14_spill] sm:$0xff] %v5567_v19  ;;  %4670 = vmatmul.mubr.msk.f32.gmra.mrb[2].mxu1 %vm203_vm1, %v318_v31  ;;  %4867 = vmatmul.mubr.msk.f32.vlgmr.msra.gmra.mrb[0].mxu0 %vm203_vm1, %v318_v31  ;;  %v5640_v34 = vld [vmem:[#allocation2 + $0x39] sm:$0xff]  ;;  %v5782_v60 = vld [vmem:[#allocation2 + $0x22] sm:$0xff] }
  0x2e   : > { %6776 = vst [vmem:[#allocation15_spill] sm:$0xff] %v5570_v20  ;;  %260 = vst.msk [vmem:[#allocation2 + $0x91] sm:$0xff] %vm203_vm1, %v5564_v18  ;;  %4915 = vmatpush3.msk.msra.mxu0 %vm445_vm0, %v5442_v3  ;;  %4672 = vmatprep.mubr.msk.f32.mxu1 %vm203_vm1, %v5619_v32  ;;  %v5758_v55 = vld [vmem:[#allocation2 + $0x1a] sm:$0xff]  ;;  %v5786_v62 = vld [vmem:[#allocation2 + $0x32] sm:$0xff] }
  0x2f   : > { %261 = vst.msk [vmem:[#allocation2 + $0x99] sm:$0xff] %vm203_vm1, %v5567_v19  ;;  %262 = vst.msk [vmem:[#allocation2 + $0xa9] sm:$0xff] %vm203_vm1, %v5570_v20  ;;  %4869 = vmatprep.mubr.msk.f32.mxu0 %vm203_vm1, %v5619_v32  ;;  %v5644_v35 = vld [vmem:[#allocation2 + $0x49] sm:$0xff]  ;;  %4964 = vmatprep.subr.msk.mxu0 %vm445_vm0, %v5632_v33  ;;  %v5803_v1 = vld [vmem:[#allocation2 + $0x3a] sm:$0xff] }
  0x30   : > { %6777 = vst [vmem:[#allocation16_spill] sm:$0xff] %v5579_v21  ;;  %6778 = vst [vmem:[#allocation17_spill] sm:$0xff] %v5582_v22  ;;  %v5656_v36 = vld [vmem:[#allocation2 + $0x51] sm:$0xff]  ;;  %v5658_v37 = vld [vmem:[#allocation2 + $0x61] sm:$0xff] }
  0x31   : > { %6779 = vst [vmem:[#allocation18_spill] sm:$0xff] %v5585_v23  ;;  %263 = vst.msk [vmem:[#allocation2 + $0xb1] sm:$0xff] %vm203_vm1, %v5579_v21  ;;  %4673 = vmatmul.mubr.msk.f32.gmra.mrb[4].mxu1 %vm203_vm1, %v5640_v34  ;;  %4870 = vmatmul.mubr.msk.f32.gmra.mrb[2].mxu0 %vm203_vm1, %v5640_v34  ;;  %v5809_v4 = vld [vmem:[#allocation2 + $0x4a] sm:$0xff]  ;;  %v5823_v10 = vld [vmem:[#allocation2 + $0x52] sm:$0xff] }
  0x32   : > { %264 = vst.msk [vmem:[#allocation2 + $0xc1] sm:$0xff] %vm203_vm1, %v5582_v22  ;;  %265 = vst.msk [vmem:[#allocation2 + $0xc9] sm:$0xff] %vm203_vm1, %v5585_v23  ;;  %4675 = vmatprep.mubr.msk.f32.mxu1 %vm203_vm1, %v5644_v35  ;;  %4872 = vmatprep.mubr.msk.f32.mxu0 %vm203_vm1, %v5644_v35  ;;  %v5679_v41 = vld [vmem:[#allocation2 + $0x69] sm:$0xff]  ;;  %v5900_v22 = vld [vmem:[#allocation2 + $0x18] sm:$0xff] }
  0x33   : > { %6780 = vst [vmem:[#allocation19_spill] sm:$0xff] %v5596_v24  ;;  %6781 = vst [vmem:[#allocation20_spill] sm:$0xff] %v5599_v25  ;;  %v5688_v43 = vld [vmem:[#allocation2 + $0x79] sm:$0xff]  ;;  %v5718_v48 = vld [vmem:[#allocation2 + $0x81] sm:$0xff] }
  0x34   : > { %6782 = vst [vmem:[#allocation21_spill] sm:$0xff] %v5602_v26  ;;  %266 = vst.msk [vmem:[#allocation2 + $0xd9] sm:$0xff] %vm203_vm1, %v5596_v24  ;;  %v5827_v31 = vld [vmem:[#allocation2 + $0x62] sm:$0xff]  ;;  %v5910_v20 = vld [vmem:[%s6682_s1 + $0xc] sm:$0xf] }
  0x35   : > { %267 = vst.msk [vmem:[#allocation2 + $0xe1] sm:$0xff] %vm203_vm1, %v5599_v25  ;;  %268 = vst.msk [vmem:[#allocation2 + $0xf1] sm:$0xff] %vm203_vm1, %v5602_v26  ;;  %4676 = vmatmul.mubr.msk.f32.gmra.mrb[6].mxu1 %vm203_vm1, %v5656_v36  ;;  %4873 = vmatmul.mubr.msk.f32.gmra.mrb[4].mxu0 %vm203_vm1, %v5656_v36  ;;  %v5722_v49 = vld [vmem:[#allocation2 + $0x91] sm:$0xff]  ;;  %v282_v26 = vld [vmem:[#allocation2] sm:$0xff] }
  0x36   : > { %6783 = vst [vmem:[#allocation22_spill] sm:$0xff] %v5611_v27  ;;  %6784 = vst [vmem:[#allocation23_spill] sm:$0xff] %v5614_v28  ;;  %4678 = vmatprep.mubr.msk.f32.mxu1 %vm203_vm1, %v5658_v37  ;;  %4875 = vmatprep.mubr.msk.f32.mxu0 %vm203_vm1, %v5658_v37  ;;  %v5732_v50 = vld [vmem:[#allocation2 + $0x99] sm:$0xff]  ;;  %v5734_v51 = vld [vmem:[#allocation2 + $0xa9] sm:$0xff] }
  0x37   : > { %6785 = vst [vmem:[#allocation24_spill] sm:$0xff] %v5617_v29  ;;  %269 = vst.msk [vmem:[#allocation2 + $0xf9] sm:$0xff] %vm203_vm1, %v5611_v27  ;;  %v283_v24 = vld [vmem:[#allocation2 + $0x8] sm:$0xff]  ;;  %v5920_v18 = vld [vmem:[#allocation2 + $0x30] sm:$0xff] }
  0x38   : > { %270 = vst.msk [vmem:[#allocation2 + $0x109] sm:$0xff] %vm203_vm1, %v5614_v28  ;;  %271 = vst.msk [vmem:[#allocation2 + $0x111] sm:$0xff] %vm203_vm1, %v5617_v29  ;;  %v5744_v52 = vld [vmem:[#allocation2 + $0xb1] sm:$0xff]  ;;  %v5940_v16 = vld [vmem:[#allocation2 + $0x48] sm:$0xff] }
  0x39   : > { %6786 = vst [vmem:[#allocation25_spill] sm:$0xff] %v5661_v38  ;;  %272 = vst.msk [vmem:[#allocation2 + $0x121] sm:$0xff] %vm203_vm1, %v5661_v38  ;;  %4679 = vmatmul.mubr.msk.f32.gmra.mrb[8].mxu1 %vm203_vm1, %v5679_v41  ;;  %4876 = vmatmul.mubr.msk.f32.gmra.mrb[6].mxu0 %vm203_vm1, %v5679_v41  ;;  %v5746_v53 = vld [vmem:[#allocation2 + $0xc1] sm:$0xff]  ;;  %v5756_v54 = vld [vmem:[#allocation2 + $0xc9] sm:$0xff] }
  0x3a   : > { %6787 = vst [vmem:[#allocation26_spill] sm:$0xff] %v5670_v39  ;;  %6788 = vst [vmem:[#allocation27_spill] sm:$0xff] %v5673_v40  ;;  %4681 = vmatprep.mubr.msk.f32.mxu1 %vm203_vm1, %v5688_v43  ;;  %4878 = vmatprep.mubr.msk.f32.mxu0 %vm203_vm1, %v5688_v43  ;;  %v5875_v29 = vld [vmem:[#allocation2 + $0xaa] sm:$0xff]  ;;  %v5887_v27 = vld [vmem:[#allocation2 + $0xb2] sm:$0xff] }
  0x3b   : > { %273 = vst.msk [vmem:[#allocation2 + $0x129] sm:$0xff] %vm203_vm1, %v5670_v39  ;;  %274 = vst.msk [vmem:[#allocation2 + $0x139] sm:$0xff] %vm203_vm1, %v5673_v40  ;;  %v5760_v56 = vld [vmem:[#allocation2 + $0xd9] sm:$0xff]  ;;  %v5889_v25 = vld [vmem:[#allocation2 + $0xc2] sm:$0xff] }
  0x3c   : > { %6789 = vst [vmem:[#allocation28_spill] sm:$0xff] %v5686_v42  ;;  %275 = vst.msk [vmem:[#allocation2 + $0x141] sm:$0xff] %vm203_vm1, %v5686_v42  ;;  %v5780_v59 = vld [vmem:[#allocation2 + $0xe1] sm:$0xff]  ;;  %v5784_v61 = vld [vmem:[#allocation2 + $0xf1] sm:$0xff] }
  0x3d   : > { %6790 = vst [vmem:[#allocation29_spill] sm:$0xff] %v5693_v44  ;;  %6791 = vst [vmem:[#allocation30_spill] sm:$0xff] %v5696_v45  ;;  %4682 = vmatmul.mubr.msk.f32.gmra.mrb[10].mxu1 %vm203_vm1, %v5718_v48  ;;  %4879 = vmatmul.mubr.msk.f32.gmra.mrb[8].mxu0 %vm203_vm1, %v5718_v48  ;;  %v5859_v42 = vld [vmem:[#allocation2 + $0x92] sm:$0xff]  ;;  %v5871_v39 = vld [vmem:[#allocation2 + $0x9a] sm:$0xff] }
  0x3e   : > { %276 = vst.msk [vmem:[#allocation2 + $0x151] sm:$0xff] %vm203_vm1, %v5693_v44  ;;  %277 = vst.msk [vmem:[#allocation2 + $0x159] sm:$0xff] %vm203_vm1, %v5696_v45  ;;  %4684 = vmatprep.mubr.msk.f32.mxu1 %vm203_vm1, %v5722_v49  ;;  %4881 = vmatprep.mubr.msk.f32.mxu0 %vm203_vm1, %v5722_v49  ;;  %v5801_v0 = vld [vmem:[#allocation2 + $0xf9] sm:$0xff]  ;;  %v5855_v45 = vld [vmem:[#allocation2 + $0x82] sm:$0xff] }
  0x3f   : > { %6792 = vst [vmem:[#allocation31_spill] sm:$0xff] %v5703_v46  ;;  %278 = vst.msk [vmem:[#allocation2 + $0x169] sm:$0xff] %vm203_vm1, %v5703_v46  ;;  %v5807_v3 = vld [vmem:[#allocation2 + $0x109] sm:$0xff]  ;;  %v5821_v9 = vld [vmem:[#allocation2 + $0x111] sm:$0xff] }
  0x40   : > { %6793 = vst [vmem:[#allocation32_spill] sm:$0xff] %v5712_v47  ;;  %279 = vst.msk [vmem:[#allocation2 + $0x171] sm:$0xff] %vm203_vm1, %v5712_v47  ;;  %v5825_v30 = vld [vmem:[#allocation2 + $0x121] sm:$0xff]  ;;  %v5898_v23 = vld [vmem:[#allocation2 + $0xca] sm:$0xff] }
  0x41   : > { %4685 = vmatmul.mubr.msk.f32.gmra.mrb[12].mxu1 %vm203_vm1, %v5732_v50  ;;  %4882 = vmatmul.mubr.msk.f32.gmra.mrb[10].mxu0 %vm203_vm1, %v5732_v50  ;;  %6794 = vst [vmem:[#allocation33_spill] sm:$0xff] %v5756_v54  ;;  %6795 = vst [vmem:[#allocation34_spill] sm:$0xff] %v5760_v56  ;;  %v5843_v47 = vld [vmem:[#allocation2 + $0x7a] sm:$0xff]  ;;  %v5918_v19 = vld [vmem:[#allocation2 + $0xe2] sm:$0xff] }
  0x42   : > { %4687 = vmatprep.mubr.msk.f32.mxu1 %vm203_vm1, %v5734_v51  ;;  %4884 = vmatprep.mubr.msk.f32.mxu0 %vm203_vm1, %v5734_v51  ;;  %6796 = vst [vmem:[#allocation35_spill] sm:$0xff] %v5763_v57  ;;  %6797 = vst [vmem:[#allocation36_spill] sm:$0xff] %v5766_v58  ;;  %v5902_v21 = vld [vmem:[#allocation2 + $0xda] sm:$0xff]  ;;  %v5942_v15 = vld [vmem:[#allocation2 + $0x10a] sm:$0xff] }
  0x43   : > { %280 = vst.msk [vmem:[#allocation2 + $0x181] sm:$0xff] %vm203_vm1, %v5763_v57  ;;  %281 = vst.msk [vmem:[#allocation2 + $0x189] sm:$0xff] %vm203_vm1, %v5766_v58  ;;  %v5839_v58 = vld [vmem:[#allocation2 + $0x6a] sm:$0xff]  ;;  %v5841_v57 = vld [vmem:[#allocation2 + $0x139] sm:$0xff] }
  0x44   : > { %6798 = vst [vmem:[#allocation37_spill] sm:$0xff] %v5780_v59  ;;  %6799 = vst [vmem:[#allocation38_spill] sm:$0xff] %v5784_v61  ;;  %v5853_v46 = vld [vmem:[#allocation2 + $0x141] sm:$0xff]  ;;  %v5936_v17 = vld [vmem:[#allocation2 + $0x38] sm:$0xff] }
  0x45   : > { %4688 = vmatmul.mubr.msk.f32.gmra.mrb[14].mxu1 %vm203_vm1, %v5744_v52  ;;  %4885 = vmatmul.mubr.msk.f32.gmra.mrb[12].mxu0 %vm203_vm1, %v5744_v52  ;;  %6800 = vst [vmem:[#allocation39_spill] sm:$0xff] %v5801_v0  ;;  %6801 = vst [vmem:[#allocation40_spill] sm:$0xff] %v5807_v3  ;;  %v5857_v44 = vld [vmem:[#allocation2 + $0x151] sm:$0xff]  ;;  %v5869_v40 = vld [vmem:[#allocation2 + $0x159] sm:$0xff] }
  0x46   : > { %4690 = vmatprep.mubr.msk.f32.mxu1 %vm203_vm1, %v5746_v53  ;;  %4887 = vmatprep.mubr.msk.f32.mxu0 %vm203_vm1, %v5746_v53  ;;  %6802 = vst [vmem:[#allocation41_spill] sm:$0xff] %v5821_v9  ;;  %6803 = vst [vmem:[#allocation42_spill] sm:$0xff] %v5825_v30  ;;  %v5873_v38 = vld [vmem:[#allocation2 + $0x169] sm:$0xff]  ;;  %v5954_v13 = vld [vmem:[#allocation2 + $0x112] sm:$0xff] }
  0x47   : > { %6805 = vst [vmem:[#allocation44_spill] sm:$0xff] %v5841_v57  ;;  %6806 = vst [vmem:[#allocation45_spill] sm:$0xff] %v5853_v46  ;;  %v5885_v28 = vld [vmem:[#allocation2 + $0x171] sm:$0xff]  ;;  %v5956_v12 = vld [vmem:[#allocation2 + $0x60] sm:$0xff] }
  0x48   : > { %6807 = vst [vmem:[#allocation46_spill] sm:$0xff] %v5857_v44  ;;  %6808 = vst [vmem:[#allocation47_spill] sm:$0xff] %v5869_v40  ;;  %v5952_v14 = vld [vmem:[#allocation2 + $0x50] sm:$0xff]  ;;  %v5958_v7 = vld [vmem:[#allocation2 + $0x122] sm:$0xff] }
  0x49   : > { %4691 = vmatmul.mubr.msk.f32.gmra.mrb[16].mxu1 %vm203_vm1, %v5756_v54  ;;  %4888 = vmatmul.mubr.msk.f32.gmra.mrb[14].mxu0 %vm203_vm1, %v5756_v54  ;;  %6809 = vst [vmem:[#allocation48_spill] sm:$0xff] %v5873_v38  ;;  %6810 = vst [vmem:[#allocation49_spill] sm:$0xff] %v5885_v28  ;;  %v5968_v11 = vld [vmem:[#allocation2 + $0x68] sm:$0xff]  ;;  %v5972_v6 = vld [vmem:[#allocation2 + $0x78] sm:$0xff] }
  0x4a   : > { %4693 = vmatprep.mubr.msk.f32.mxu1 %vm203_vm1, %v5760_v56  ;;  %4916 = vmatprep.mubr.msk.f32.mxu0 %vm203_vm1, %v5758_v55  ;;  %6811 = vst [vmem:[#allocation50_spill] sm:$0xff] %v5900_v22  ;;  %6813 = vst [vmem:[#allocation52_spill] sm:$0xff] %v5920_v18  ;;  %v5970_v5 = vld [vmem:[#allocation2 + $0x12a] sm:$0xff]  ;;  %v6046_v54 = vld [vmem:[#allocation2 + $0xe0] sm:$0xff] }
  0x4b   : > { %6814 = vst [vmem:[#allocation53_spill] sm:$0xff] %v5936_v17  ;;  %6815 = vst [vmem:[#allocation54_spill] sm:$0xff] %v5940_v16  ;;  %v6034_v56 = vld [vmem:[#allocation2 + $0x18a] sm:$0xff] }
  0x4c   : > { %6816 = vst [vmem:[#allocation55_spill] sm:$0xff] %v5952_v14  ;;  %6817 = vst [vmem:[#allocation56_spill] sm:$0xff] %v5956_v12 }
  0x4d   : > { %4694 = vmatmul.mubr.msk.f32.gmra.mrb[18].mxu1 %vm203_vm1, %v5780_v59  ;;  %4917 = vmatmul.mubr.msk.f32.vlgmr.msra.gmra.mrb[0].mxu0 %vm203_vm1, %v5782_v60  ;;  %6818 = vst [vmem:[#allocation57_spill] sm:$0xff] %v5968_v11  ;;  %6819 = vst [vmem:[#allocation58_spill] sm:$0xff] %v5972_v6  ;;  %v6022_v59 = vld [vmem:[#allocation2 + $0x182] sm:$0xff] }
  0x4e   : > { %4965 = vmatpush3.msk.msra.mxu0 %vm445_vm0, %v5632_v33  ;;  %4696 = vmatprep.mubr.msk.f32.mxu1 %vm203_vm1, %v5784_v61  ;;  %v5837_v33 = vld [vmem:[#allocation2 + $0x129] sm:$0xff]  ;;  %v6020_v61 = vld [vmem:[#allocation2 + $0xc0] sm:$0xff]  ;;  %6825 = vst [vmem:[#allocation64_spill] sm:$0xff] %v6022_v59  ;;  %6826 = vst [vmem:[#allocation65_spill] sm:$0xff] %v6034_v56 }
  0x4f   : > { %4919 = vmatprep.mubr.msk.f32.mxu0 %vm203_vm1, %v5786_v62  ;;  %5014 = vmatprep.subr.msk.mxu0 %vm445_vm0, %v5791_v63  ;;  %6804 = vst [vmem:[#allocation43_spill] sm:$0xff] %v5837_v33 }
  0x51   : > { %4697 = vmatmul.mubr.msk.f32.gmra.mrb[20].mxu1 %vm203_vm1, %v5801_v0  ;;  %4920 = vmatmul.mubr.msk.f32.gmra.mrb[2].mxu0 %vm203_vm1, %v5803_v1  ;;  %v6018_v0 = vld [vmem:[#allocation2 + $0x172] sm:$0xff] }
  0x52   : > { %4699 = vmatprep.mubr.msk.f32.mxu1 %vm203_vm1, %v5807_v3  ;;  %4922 = vmatprep.mubr.msk.f32.mxu0 %vm203_vm1, %v5809_v4  ;;  %v6016_v3 = vld [vmem:[#allocation2 + $0xb0] sm:$0xff]  ;;  %6824 = vst [vmem:[#allocation63_spill] sm:$0xff] %v6018_v0 }
  0x53   : > { %6823 = vst [vmem:[#allocation62_spill] sm:$0xff] %v6016_v3 }
  0x55   : > { %4700 = vmatmul.mubr.msk.f32.gmra.mrb[22].mxu1 %vm203_vm1, %v5821_v9  ;;  %4923 = vmatmul.mubr.msk.f32.gmra.mrb[4].mxu0 %vm203_vm1, %v5823_v10  ;;  %v6006_v9 = vld [vmem:[#allocation2 + $0x16a] sm:$0xff] }
  0x56   : > { %4702 = vmatprep.mubr.msk.f32.mxu1 %vm203_vm1, %v5825_v30  ;;  %4925 = vmatprep.mubr.msk.f32.mxu0 %vm203_vm1, %v5827_v31  ;;  %v6004_v30 = vld [vmem:[#allocation2 + $0xa8] sm:$0xff] }
  0x59   : > { %4703 = vmatmul.mubr.msk.f32.gmra.mrb[24].mxu1 %vm203_vm1, %v5837_v33  ;;  %4926 = vmatmul.mubr.msk.f32.gmra.mrb[6].mxu0 %vm203_vm1, %v5839_v58  ;;  %v6002_v33 = vld [vmem:[#allocation2 + $0x15a] sm:$0xff] }
  0x5a   : > { %4705 = vmatprep.mubr.msk.f32.mxu1 %vm203_vm1, %v5841_v57  ;;  %4928 = vmatprep.mubr.msk.f32.mxu0 %vm203_vm1, %v5843_v47  ;;  %v6000_v57 = vld [vmem:[#allocation2 + $0x98] sm:$0xff] }
  0x5b   : > { %6822 = vst [vmem:[#allocation61_spill] sm:$0xff] %v6000_v57 }
  0x5d   : > { %4706 = vmatmul.mubr.msk.f32.gmra.mrb[26].mxu1 %vm203_vm1, %v5853_v46  ;;  %4929 = vmatmul.mubr.msk.f32.gmra.mrb[8].mxu0 %vm203_vm1, %v5855_v45  ;;  %v5990_v46 = vld [vmem:[#allocation2 + $0x152] sm:$0xff] }
  0x5e   : > { %4708 = vmatprep.mubr.msk.f32.mxu1 %vm203_vm1, %v5857_v44  ;;  %4931 = vmatprep.mubr.msk.f32.mxu0 %vm203_vm1, %v5859_v42  ;;  %v5988_v44 = vld [vmem:[#allocation2 + $0x90] sm:$0xff] }
  0x5f   : > { %6821 = vst [vmem:[#allocation60_spill] sm:$0xff] %v5988_v44 }
  0x61   : > { %4709 = vmatmul.mubr.msk.f32.gmra.mrb[28].mxu1 %vm203_vm1, %v5869_v40  ;;  %4932 = vmatmul.mubr.msk.f32.gmra.mrb[10].mxu0 %vm203_vm1, %v5871_v39  ;;  %v5986_v40 = vld [vmem:[#allocation2 + $0x142] sm:$0xff] }
  0x62   : > { %4711 = vmatprep.mubr.msk.f32.mxu1 %vm203_vm1, %v5873_v38  ;;  %4934 = vmatprep.mubr.msk.f32.mxu0 %vm203_vm1, %v5875_v29  ;;  %v5984_v38 = vld [vmem:[#allocation2 + $0x80] sm:$0xff] }
  0x63   : > { %6820 = vst [vmem:[#allocation59_spill] sm:$0xff] %v5984_v38 }
  0x65   : > { %4712 = vmatmul.mubr.msk.f32.gmra.mrb[30].mxu1 %vm203_vm1, %v5885_v28  ;;  %4935 = vmatmul.mubr.msk.f32.gmra.mrb[12].mxu0 %vm203_vm1, %v5887_v27  ;;  %v5974_v28 = vld [vmem:[#allocation2 + $0x13a] sm:$0xff] }
  0x66   : > { %4716 = vmatprep.mubr.msk.f32.mxu1 %vm203_vm1, %v282_v26  ;;  %4937 = vmatprep.mubr.msk.f32.mxu0 %vm203_vm1, %v5889_v25  ;;  %v5916_v26 = vld [vmem:[#allocation2 + $0x20] sm:$0xff] }
  0x67   : > { %6812 = vst [vmem:[#allocation51_spill] sm:$0xff] %v5916_v26 }
  0x69   : > { %4717 = vmatmul.mubr.msk.f32.vlgmr.msra.gmra.mrb[0].mxu1 %vm203_vm1, %v283_v24  ;;  %4938 = vmatmul.mubr.msk.f32.gmra.mrb[14].mxu0 %vm203_vm1, %v5898_v23  ;;  %v5924_v24 = vld [vmem:[#allocation2 + $0xf2] sm:$0xff] }
  0x6a   : > { %4719 = vmatprep.mubr.msk.f32.mxu1 %vm203_vm1, %v5900_v22  ;;  %4940 = vmatprep.mubr.msk.f32.mxu0 %vm203_vm1, %v5902_v21  ;;  %v6036_v22 = vld [vmem:[#allocation2 + $0xd8] sm:$0xff] }
  0x6b   : > { %4765 = vmatpush3.msk.msra.mxu1 %vm445_vm0, %v5517_v8  ;;  %v5938_v8 = vld [vmem:[#allocation2 + $0xfa] sm:$0xff] }
  0x6c   : > { %4814 = vmatprep.subr.msk.mxu1 %vm445_vm0, %v5910_v20 }
  0x6d   : > { %4720 = vmatmul.mubr.msk.f32.gmra.mrb[2].mxu1 %vm203_vm1, %v5916_v26  ;;  %4941 = vmatmul.mubr.msk.f32.gmra.mrb[16].mxu0 %vm203_vm1, %v5918_v19  ;;  %v6032_v26 = vld [vmem:[#allocation2 + $0xc8] sm:$0xff] }
  0x6e   : > { %4722 = vmatprep.mubr.msk.f32.mxu1 %vm203_vm1, %v5920_v18  ;;  %4943 = vmatprep.mubr.msk.f32.mxu0 %vm203_vm1, %v5924_v24 }
  0x71   : > { %4723 = vmatmul.mubr.msk.f32.gmra.mrb[4].mxu1 %vm203_vm1, %v5936_v17  ;;  %4944 = vmatmul.mubr.msk.f32.gmra.mrb[18].mxu0 %vm203_vm1, %v5938_v8 }
  0x72   : > { %4725 = vmatprep.mubr.msk.f32.mxu1 %vm203_vm1, %v5940_v16  ;;  %4946 = vmatprep.mubr.msk.f32.mxu0 %vm203_vm1, %v5942_v15 }
  0x75   : > { %4726 = vmatmul.mubr.msk.f32.gmra.mrb[6].mxu1 %vm203_vm1, %v5952_v14  ;;  %4947 = vmatmul.mubr.msk.f32.gmra.mrb[20].mxu0 %vm203_vm1, %v5954_v13 }
  0x76   : > { %4728 = vmatprep.mubr.msk.f32.mxu1 %vm203_vm1, %v5956_v12  ;;  %4949 = vmatprep.mubr.msk.f32.mxu0 %vm203_vm1, %v5958_v7 }
  0x79   : > { %4729 = vmatmul.mubr.msk.f32.gmra.mrb[8].mxu1 %vm203_vm1, %v5968_v11  ;;  %4950 = vmatmul.mubr.msk.f32.gmra.mrb[22].mxu0 %vm203_vm1, %v5970_v5 }
  0x7a   : > { %4731 = vmatprep.mubr.msk.f32.mxu1 %vm203_vm1, %v5972_v6  ;;  %4952 = vmatprep.mubr.msk.f32.mxu0 %vm203_vm1, %v5974_v28 }
  0x7d   : > { %4732 = vmatmul.mubr.msk.f32.gmra.mrb[10].mxu1 %vm203_vm1, %v5984_v38  ;;  %4953 = vmatmul.mubr.msk.f32.gmra.mrb[24].mxu0 %vm203_vm1, %v5986_v40 }
  0x7e   : > { %4734 = vmatprep.mubr.msk.f32.mxu1 %vm203_vm1, %v5988_v44  ;;  %4955 = vmatprep.mubr.msk.f32.mxu0 %vm203_vm1, %v5990_v46 }
  0x81   : > { %4735 = vmatmul.mubr.msk.f32.gmra.mrb[12].mxu1 %vm203_vm1, %v6000_v57  ;;  %4956 = vmatmul.mubr.msk.f32.gmra.mrb[26].mxu0 %vm203_vm1, %v6002_v33 }
  0x82   : > { %4737 = vmatprep.mubr.msk.f32.mxu1 %vm203_vm1, %v6004_v30  ;;  %4958 = vmatprep.mubr.msk.f32.mxu0 %vm203_vm1, %v6006_v9 }
  0x85   : > { %4738 = vmatmul.mubr.msk.f32.gmra.mrb[14].mxu1 %vm203_vm1, %v6016_v3  ;;  %4959 = vmatmul.mubr.msk.f32.gmra.mrb[28].mxu0 %vm203_vm1, %v6018_v0  ;;  %v6053_v0 = vld [vmem:[%s6682_s1 + $0x20] sm:$0xf] }
  0x86   : > { %4740 = vmatprep.mubr.msk.f32.mxu1 %vm203_vm1, %v6020_v61  ;;  %4961 = vmatprep.mubr.msk.f32.mxu0 %vm203_vm1, %v6022_v59  ;;  %v6048_v59 = vld [vmem:[#allocation2 + $0xf0] sm:$0xff] }
  0x89   : > { %4741 = vmatmul.mubr.msk.f32.gmra.mrb[16].mxu1 %vm203_vm1, %v6032_v26  ;;  %4962 = vmatmul.mubr.msk.f32.gmra.mrb[30].mxu0 %vm203_vm1, %v6034_v56  ;;  %v6063_v56 = vld [vmem:[#allocation2 + $0xf8] sm:$0xff] }
  0x8a   : > { %4743 = vmatprep.mubr.msk.f32.mxu1 %vm203_vm1, %v6036_v22  ;;  %4966 = vmatprep.mubr.msk.f32.mxu0 %vm203_vm1, %v5920_v18  ;;  %v6067_v18 = vld [vmem:[#allocation2 + $0x108] sm:$0xff] }
  0x8d   : > { %4744 = vmatmul.mubr.msk.f32.gmra.mrb[18].mxu1 %vm203_vm1, %v6046_v54  ;;  %4967 = vmatmul.mubr.msk.f32.vlgmr.msra.gmra.mrb[0].mxu0 %vm203_vm1, %v5936_v17  ;;  %v6093_v17 = vld [vmem:[#allocation2 + $0x138] sm:$0xff] }
  0x8e   : > { %5015 = vmatpush3.msk.msra.mxu0 %vm445_vm0, %v5791_v63  ;;  %4746 = vmatprep.mubr.msk.f32.mxu1 %vm203_vm1, %v6048_v59  ;;  %v6079_v63 = vld [vmem:[#allocation2 + $0x110] sm:$0xff] }
  0x8f   : > { %4969 = vmatprep.mubr.msk.f32.mxu0 %vm203_vm1, %v5940_v16  ;;  %5064 = vmatprep.subr.msk.mxu0 %vm445_vm0, %v6053_v0  ;;  %v6081_v16 = vld [vmem:[#allocation2 + $0x120] sm:$0xff] }
  0x91   : > { %4747 = vmatmul.mubr.msk.f32.gmra.mrb[20].mxu1 %vm203_vm1, %v6063_v56  ;;  %4970 = vmatmul.mubr.msk.f32.gmra.mrb[2].mxu0 %vm203_vm1, %v5952_v14  ;;  %v6091_v14 = vld [vmem:[#allocation2 + $0x128] sm:$0xff] }
  0x92   : > { %4749 = vmatprep.mubr.msk.f32.mxu1 %vm203_vm1, %v6067_v18  ;;  %4972 = vmatprep.mubr.msk.f32.mxu0 %vm203_vm1, %v5956_v12  ;;  %v6105_v12 = vld [vmem:[#allocation2 + $0x150] sm:$0xff] }
  0x95   : > { %4750 = vmatmul.mubr.msk.f32.gmra.mrb[22].mxu1 %vm203_vm1, %v6079_v63  ;;  %4973 = vmatmul.mubr.msk.f32.gmra.mrb[4].mxu0 %vm203_vm1, %v5968_v11  ;;  %v6103_v11 = vld [vmem:[#allocation2 + $0x140] sm:$0xff] }
  0x96   : > { %4752 = vmatprep.mubr.msk.f32.mxu1 %vm203_vm1, %v6081_v16  ;;  %4975 = vmatprep.mubr.msk.f32.mxu0 %vm203_vm1, %v5972_v6  ;;  %v6117_v6 = vld [vmem:[#allocation2 + $0x168] sm:$0xff] }
  0x99   : > { %4753 = vmatmul.mubr.msk.f32.gmra.mrb[24].mxu1 %vm203_vm1, %v6091_v14  ;;  %4976 = vmatmul.mubr.msk.f32.gmra.mrb[6].mxu0 %vm203_vm1, %v5984_v38  ;;  %v6115_v38 = vld [vmem:[#allocation2 + $0x158] sm:$0xff] }
  0x9a   : > { %4755 = vmatprep.mubr.msk.f32.mxu1 %vm203_vm1, %v6093_v17  ;;  %4978 = vmatprep.mubr.msk.f32.mxu0 %vm203_vm1, %v5988_v44  ;;  %v998_v44 = vld [vmem:[#allocation2 + $0x2] sm:$0xff] }
  0x9d   : > { %4756 = vmatmul.mubr.msk.f32.gmra.mrb[26].mxu1 %vm203_vm1, %v6103_v11  ;;  %4979 = vmatmul.mubr.msk.f32.gmra.mrb[8].mxu0 %vm203_vm1, %v6000_v57  ;;  %v6127_v57 = vld [vmem:[#allocation2 + $0x170] sm:$0xff] }
  0x9e   : > { %4758 = vmatprep.mubr.msk.f32.mxu1 %vm203_vm1, %v6105_v12  ;;  %4981 = vmatprep.mubr.msk.f32.mxu0 %vm203_vm1, %v6004_v30 }
  0xa1   : > { %4759 = vmatmul.mubr.msk.f32.gmra.mrb[28].mxu1 %vm203_vm1, %v6115_v38  ;;  %4982 = vmatmul.mubr.msk.f32.gmra.mrb[10].mxu0 %vm203_vm1, %v6016_v3  ;;  %v999_v3 = vld [vmem:[#allocation2 + $0xa] sm:$0xff] }
  0xa2   : > { %4761 = vmatprep.mubr.msk.f32.mxu1 %vm203_vm1, %v6117_v6  ;;  %4984 = vmatprep.mubr.msk.f32.mxu0 %vm203_vm1, %v6020_v61 }
  0xa5   : > { %4762 = vmatmul.mubr.msk.f32.gmra.mrb[30].mxu1 %vm203_vm1, %v6127_v57  ;;  %4985 = vmatmul.mubr.msk.f32.gmra.mrb[12].mxu0 %vm203_vm1, %v6032_v26 }
  0xa6   : > { %4766 = vmatprep.mubr.msk.f32.mxu1 %vm203_vm1, %v998_v44  ;;  %4987 = vmatprep.mubr.msk.f32.mxu0 %vm203_vm1, %v6036_v22  ;;  %v6197_v44 = vld [vmem:[#allocation2 + $0x188] sm:$0xff] }
  0xa9   : > { %4767 = vmatmul.mubr.msk.f32.vlgmr.msra.gmra.mrb[0].mxu1 %vm203_vm1, %v999_v3  ;;  %4988 = vmatmul.mubr.msk.f32.gmra.mrb[14].mxu0 %vm203_vm1, %v6046_v54  ;;  %v6841_v3 = vld [vmem:[#allocation56_spill] sm:$0xff] }
  0xaa   : > { %4769 = vmatprep.mubr.msk.f32.mxu1 %vm203_vm1, %v5758_v55  ;;  %4990 = vmatprep.mubr.msk.f32.mxu0 %vm203_vm1, %v6048_v59  ;;  %v2589_v55 = vld [vmem:[#allocation2 + $0x198] sm:$0xff] }
  0xab   : > { %4815 = vmatpush3.msk.msra.mxu1 %vm445_vm0, %v5910_v20  ;;  %v6187_v20 = vld [vmem:[#allocation2 + $0x180] sm:$0xff] }
  0xac   : > { %5114 = vmatprep.subr.msk.mxu1 %vm445_vm0, %v5431_v2 }
  0xad   : > { %4770 = vmatmul.mubr.msk.f32.gmra.mrb[2].mxu1 %vm203_vm1, %v5782_v60  ;;  %4991 = vmatmul.mubr.msk.f32.gmra.mrb[16].mxu0 %vm203_vm1, %v6063_v56  ;;  %v2590_v60 = vld [vmem:[#allocation2 + $0x1a0] sm:$0xff] }
  0xae   : > { %4772 = vmatprep.mubr.msk.f32.mxu1 %vm203_vm1, %v5786_v62  ;;  %4993 = vmatprep.mubr.msk.f32.mxu0 %vm203_vm1, %v6067_v18 }
  0xb1   : > { %4773 = vmatmul.mubr.msk.f32.gmra.mrb[4].mxu1 %vm203_vm1, %v5803_v1  ;;  %4994 = vmatmul.mubr.msk.f32.gmra.mrb[18].mxu0 %vm203_vm1, %v6079_v63 }
  0xb2   : > { %4775 = vmatprep.mubr.msk.f32.mxu1 %vm203_vm1, %v5809_v4  ;;  %4996 = vmatprep.mubr.msk.f32.mxu0 %vm203_vm1, %v6081_v16 }
  0xb5   : > { %4776 = vmatmul.mubr.msk.f32.gmra.mrb[6].mxu1 %vm203_vm1, %v5823_v10  ;;  %4997 = vmatmul.mubr.msk.f32.gmra.mrb[20].mxu0 %vm203_vm1, %v6091_v14 }
  0xb6   : > { %4778 = vmatprep.mubr.msk.f32.mxu1 %vm203_vm1, %v5827_v31  ;;  %4999 = vmatprep.mubr.msk.f32.mxu0 %vm203_vm1, %v6093_v17 }
  0xb9   : > { %4779 = vmatmul.mubr.msk.f32.gmra.mrb[8].mxu1 %vm203_vm1, %v5839_v58  ;;  %5000 = vmatmul.mubr.msk.f32.gmra.mrb[22].mxu0 %vm203_vm1, %v6103_v11 }
  0xba   : > { %4781 = vmatprep.mubr.msk.f32.mxu1 %vm203_vm1, %v5843_v47  ;;  %5002 = vmatprep.mubr.msk.f32.mxu0 %vm203_vm1, %v6105_v12 }
  0xbd   : > { %4782 = vmatmul.mubr.msk.f32.gmra.mrb[10].mxu1 %vm203_vm1, %v5855_v45  ;;  %5003 = vmatmul.mubr.msk.f32.gmra.mrb[24].mxu0 %vm203_vm1, %v6115_v38 }
  0xbe   : > { %4784 = vmatprep.mubr.msk.f32.mxu1 %vm203_vm1, %v5859_v42  ;;  %5005 = vmatprep.mubr.msk.f32.mxu0 %vm203_vm1, %v6117_v6 }
  0xc1   : > { %4785 = vmatmul.mubr.msk.f32.gmra.mrb[12].mxu1 %vm203_vm1, %v5871_v39  ;;  %5006 = vmatmul.mubr.msk.f32.gmra.mrb[26].mxu0 %vm203_vm1, %v6127_v57 }
  0xc2   : > { %4787 = vmatprep.mubr.msk.f32.mxu1 %vm203_vm1, %v5875_v29  ;;  %5008 = vmatprep.mubr.msk.f32.mxu0 %vm203_vm1, %v6187_v20 }
  0xc5   : > { %4788 = vmatmul.mubr.msk.f32.gmra.mrb[14].mxu1 %vm203_vm1, %v5887_v27  ;;  %5009 = vmatmul.mubr.msk.f32.gmra.mrb[28].mxu0 %vm203_vm1, %v6197_v44 }
  0xc6   : > { %4790 = vmatprep.mubr.msk.f32.mxu1 %vm203_vm1, %v5889_v25  ;;  %5011 = vmatprep.mubr.msk.f32.mxu0 %vm203_vm1, %v2589_v55  ;;  %v6843_v55 = vld [vmem:[#allocation57_spill] sm:$0xff] }
  0xc9   : > { %4791 = vmatmul.mubr.msk.f32.gmra.mrb[16].mxu1 %vm203_vm1, %v5898_v23  ;;  %5012 = vmatmul.mubr.msk.f32.gmra.mrb[30].mxu0 %vm203_vm1, %v2590_v60  ;;  %v6844_v60 = vld [vmem:[#allocation43_spill] sm:$0xff] }
  0xca   : > { %4793 = vmatprep.mubr.msk.f32.mxu1 %vm203_vm1, %v5902_v21  ;;  %5016 = vmatprep.mubr.msk.f32.mxu0 %vm203_vm1, %v5619_v32  ;;  %v6827_v32 = vld [vmem:[#allocation63_spill] sm:$0xff] }
  0xcd   : > { %4794 = vmatmul.mubr.msk.f32.gmra.mrb[18].mxu1 %vm203_vm1, %v5918_v19  ;;  %5017 = vmatmul.mubr.msk.f32.vlgmr.msra.gmra.mrb[0].mxu0 %vm203_vm1, %v5640_v34  ;;  %v6828_v34 = vld [vmem:[#allocation33_spill] sm:$0xff] }
  0xce   : > { %5065 = vmatpush3.msk.msra.mxu0 %vm445_vm0, %v6053_v0  ;;  %4796 = vmatprep.mubr.msk.f32.mxu1 %vm203_vm1, %v5924_v24  ;;  %v6840_v0 = vld [vmem:[#allocation41_spill] sm:$0xff] }
  0xcf   : > { %5019 = vmatprep.mubr.msk.f32.mxu0 %vm203_vm1, %v5644_v35  ;;  %v6829_v35 = vld [vmem:[#allocation50_spill] sm:$0xff] }
  0xd1   : > { %4797 = vmatmul.mubr.msk.f32.gmra.mrb[20].mxu1 %vm203_vm1, %v5938_v8  ;;  %5020 = vmatmul.mubr.msk.f32.gmra.mrb[2].mxu0 %vm203_vm1, %v5656_v36  ;;  %v6830_v36 = vld [vmem:[#allocation34_spill] sm:$0xff] }
  0xd2   : > { %4799 = vmatprep.mubr.msk.f32.mxu1 %vm203_vm1, %v5942_v15  ;;  %5022 = vmatprep.mubr.msk.f32.mxu0 %vm203_vm1, %v5658_v37  ;;  %v6831_v37 = vld [vmem:[#allocation51_spill] sm:$0xff] }
  0xd5   : > { %4800 = vmatmul.mubr.msk.f32.gmra.mrb[22].mxu1 %vm203_vm1, %v5954_v13  ;;  %5023 = vmatmul.mubr.msk.f32.gmra.mrb[4].mxu0 %vm203_vm1, %v5679_v41  ;;  %v6832_v41 = vld [vmem:[#allocation37_spill] sm:$0xff] }
  0xd6   : > { %4802 = vmatprep.mubr.msk.f32.mxu1 %vm203_vm1, %v5958_v7  ;;  %5025 = vmatprep.mubr.msk.f32.mxu0 %vm203_vm1, %v5688_v43  ;;  %v6833_v43 = vld [vmem:[#allocation52_spill] sm:$0xff] }
  0xd9   : > { %4803 = vmatmul.mubr.msk.f32.gmra.mrb[24].mxu1 %vm203_vm1, %v5970_v5  ;;  %5026 = vmatmul.mubr.msk.f32.gmra.mrb[6].mxu0 %vm203_vm1, %v5718_v48  ;;  %v6834_v48 = vld [vmem:[#allocation38_spill] sm:$0xff] }
  0xda   : > { %4805 = vmatprep.mubr.msk.f32.mxu1 %vm203_vm1, %v5974_v28  ;;  %5028 = vmatprep.mubr.msk.f32.mxu0 %vm203_vm1, %v5722_v49  ;;  %v6835_v49 = vld [vmem:[#allocation53_spill] sm:$0xff] }
  0xdd   : > { %4806 = vmatmul.mubr.msk.f32.gmra.mrb[26].mxu1 %vm203_vm1, %v5986_v40  ;;  %5029 = vmatmul.mubr.msk.f32.gmra.mrb[8].mxu0 %vm203_vm1, %v5732_v50  ;;  %v6836_v50 = vld [vmem:[#allocation39_spill] sm:$0xff] }
  0xde   : > { %4808 = vmatprep.mubr.msk.f32.mxu1 %vm203_vm1, %v5990_v46  ;;  %5031 = vmatprep.mubr.msk.f32.mxu0 %vm203_vm1, %v5734_v51  ;;  %v6837_v51 = vld [vmem:[#allocation54_spill] sm:$0xff] }
  0xe1   : > { %4809 = vmatmul.mubr.msk.f32.gmra.mrb[28].mxu1 %vm203_vm1, %v6002_v33  ;;  %5032 = vmatmul.mubr.msk.f32.gmra.mrb[10].mxu0 %vm203_vm1, %v5744_v52  ;;  %v6838_v52 = vld [vmem:[#allocation40_spill] sm:$0xff] }
  0xe2   : > { %4811 = vmatprep.mubr.msk.f32.mxu1 %vm203_vm1, %v6006_v9  ;;  %5034 = vmatprep.mubr.msk.f32.mxu0 %vm203_vm1, %v5746_v53  ;;  %v6839_v53 = vld [vmem:[#allocation55_spill] sm:$0xff] }
  0xe5   : > { %4812 = vmatmul.mubr.msk.f32.gmra.mrb[30].mxu1 %vm203_vm1, %v6827_v32  ;;  %5035 = vmatmul.mubr.msk.f32.gmra.mrb[12].mxu0 %vm203_vm1, %v6828_v34  ;;  %v6845_v34 = vld [vmem:[#allocation58_spill] sm:$0xff] }
  0xe6   : > { %4816 = vmatprep.mubr.msk.f32.mxu1 %vm203_vm1, %v6829_v35  ;;  %5037 = vmatprep.mubr.msk.f32.mxu0 %vm203_vm1, %v6830_v36  ;;  %v6846_v35 = vld [vmem:[#allocation44_spill] sm:$0xff] }
  0xe9   : > { %4817 = vmatmul.mubr.msk.f32.vlgmr.msra.gmra.mrb[0].mxu1 %vm203_vm1, %v6831_v37  ;;  %5038 = vmatmul.mubr.msk.f32.gmra.mrb[14].mxu0 %vm203_vm1, %v6832_v41  ;;  %v6847_v37 = vld [vmem:[#allocation59_spill] sm:$0xff] }
  0xea   : > { %4819 = vmatprep.mubr.msk.f32.mxu1 %vm203_vm1, %v6833_v43  ;;  %5040 = vmatprep.mubr.msk.f32.mxu0 %vm203_vm1, %v6834_v48  ;;  %v6848_v43 = vld [vmem:[#allocation45_spill] sm:$0xff] }
  0xeb   : > { %5115 = vmatpush3.msk.msra.mxu1 %vm445_vm0, %v5431_v2  ;;  %v6842_v2 = vld [vmem:[#allocation42_spill] sm:$0xff] }
  0xed   : > { %4820 = vmatmul.mubr.msk.f32.gmra.mrb[2].mxu1 %vm203_vm1, %v6835_v49  ;;  %5041 = vmatmul.mubr.msk.f32.gmra.mrb[16].mxu0 %vm203_vm1, %v6836_v50  ;;  %v6849_v49 = vld [vmem:[#allocation60_spill] sm:$0xff] }
  0xee   : > { %4822 = vmatprep.mubr.msk.f32.mxu1 %vm203_vm1, %v6837_v51  ;;  %5043 = vmatprep.mubr.msk.f32.mxu0 %vm203_vm1, %v6838_v52  ;;  %v6850_v51 = vld [vmem:[#allocation46_spill] sm:$0xff] }
  0xf1   : > { %4823 = vmatmul.mubr.msk.f32.gmra.mrb[4].mxu1 %vm203_vm1, %v6839_v53  ;;  %5044 = vmatmul.mubr.msk.f32.gmra.mrb[18].mxu0 %vm203_vm1, %v6840_v0  ;;  %v6851_v53 = vld [vmem:[#allocation61_spill] sm:$0xff] }
  0xf2   : > { %4825 = vmatprep.mubr.msk.f32.mxu1 %vm203_vm1, %v6841_v3  ;;  %5046 = vmatprep.mubr.msk.f32.mxu0 %vm203_vm1, %v6842_v2  ;;  %v6852_v3 = vld [vmem:[#allocation47_spill] sm:$0xff] }
  0xf5   : > { %4826 = vmatmul.mubr.msk.f32.gmra.mrb[6].mxu1 %vm203_vm1, %v6843_v55  ;;  %5047 = vmatmul.mubr.msk.f32.gmra.mrb[20].mxu0 %vm203_vm1, %v6844_v60  ;;  %v6853_v55 = vld [vmem:[#allocation48_spill] sm:$0xff] }
  0xf6   : > { %4828 = vmatprep.mubr.msk.f32.mxu1 %vm203_vm1, %v6845_v34  ;;  %5049 = vmatprep.mubr.msk.f32.mxu0 %vm203_vm1, %v6846_v35  ;;  %v6321_v34 = vld [vmem:[#allocation2 + $0x181] sm:$0xff] }
  0xf9   : > { %4829 = vmatmul.mubr.msk.f32.gmra.mrb[8].mxu1 %vm203_vm1, %v6847_v37  ;;  %5050 = vmatmul.mubr.msk.f32.gmra.mrb[22].mxu0 %vm203_vm1, %v6848_v43  ;;  %v6854_v37 = vld [vmem:[#allocation62_spill] sm:$0xff] }
  0xfa   : > { %4831 = vmatprep.mubr.msk.f32.mxu1 %vm203_vm1, %v6849_v49  ;;  %5052 = vmatprep.mubr.msk.f32.mxu0 %vm203_vm1, %v6850_v51  ;;  %v6855_v49 = vld [vmem:[#allocation49_spill] sm:$0xff] }
  0xfd   : > { %4832 = vmatmul.mubr.msk.f32.gmra.mrb[10].mxu1 %vm203_vm1, %v6851_v53  ;;  %5053 = vmatmul.mubr.msk.f32.gmra.mrb[24].mxu0 %vm203_vm1, %v6852_v3  ;;  %v6331_v53 = vld [vmem:[#allocation2 + $0x189] sm:$0xff] }
  0xfe   : > { %4834 = vmatprep.mubr.msk.f32.mxu1 %vm203_vm1, %v6004_v30  ;;  %5055 = vmatprep.mubr.msk.f32.mxu0 %vm203_vm1, %v6853_v55  ;;  %v2979_v30 = vld [vmem:[#allocation2 + $0x199] sm:$0xff] }
 0x101   : > { %4835 = vmatmul.mubr.msk.f32.gmra.mrb[12].mxu1 %vm203_vm1, %v6854_v37  ;;  %5056 = vmatmul.mubr.msk.f32.gmra.mrb[26].mxu0 %vm203_vm1, %v6855_v49  ;;  %v2980_v37 = vld [vmem:[#allocation2 + $0x1a1] sm:$0xff] }
 0x102   : > { %4837 = vmatprep.mubr.msk.f32.mxu1 %vm203_vm1, %v6020_v61  ;;  %5058 = vmatprep.mubr.msk.f32.mxu0 %vm203_vm1, %v6321_v34 }
 0x105   : > { %4838 = vmatmul.mubr.msk.f32.gmra.mrb[14].mxu1 %vm203_vm1, %v6032_v26  ;;  %5059 = vmatmul.mubr.msk.f32.gmra.mrb[28].mxu0 %vm203_vm1, %v6331_v53 }
 0x106   : > { %4840 = vmatprep.mubr.msk.f32.mxu1 %vm203_vm1, %v6036_v22  ;;  %5061 = vmatprep.mubr.msk.f32.mxu0 %vm203_vm1, %v2979_v30 }
 0x109   : > { %4841 = vmatmul.mubr.msk.f32.gmra.mrb[16].mxu1 %vm203_vm1, %v6046_v54  ;;  %5062 = vmatmul.mubr.msk.f32.gmra.mrb[30].mxu0 %vm203_vm1, %v2980_v37 }
 0x10a   : > { %4843 = vmatprep.mubr.msk.f32.mxu1 %vm203_vm1, %v6048_v59  ;;  %5066 = vmatprep.mubr.msk.f32.mxu0 %vm203_vm1, %v5786_v62 }
 0x10d   : > { %4844 = vmatmul.mubr.msk.f32.gmra.mrb[18].mxu1 %vm203_vm1, %v6063_v56  ;;  %5067 = vmatmul.mubr.msk.f32.vlgmr.msra.gmra.mrb[0].mxu0 %vm203_vm1, %v5803_v1 }
 0x10e   : > { %4846 = vmatprep.mubr.msk.f32.mxu1 %vm203_vm1, %v6067_v18  ;;  %5069 = vmatprep.mubr.msk.f32.mxu0 %vm203_vm1, %v5809_v4 }
 0x111   : > { %4847 = vmatmul.mubr.msk.f32.gmra.mrb[20].mxu1 %vm203_vm1, %v6079_v63  ;;  %5070 = vmatmul.mubr.msk.f32.gmra.mrb[2].mxu0 %vm203_vm1, %v5823_v10 }
 0x112   : > { %4849 = vmatprep.mubr.msk.f32.mxu1 %vm203_vm1, %v6081_v16  ;;  %5072 = vmatprep.mubr.msk.f32.mxu0 %vm203_vm1, %v5827_v31 }
 0x115   : > { %4850 = vmatmul.mubr.msk.f32.gmra.mrb[22].mxu1 %vm203_vm1, %v6091_v14  ;;  %5073 = vmatmul.mubr.msk.f32.gmra.mrb[4].mxu0 %vm203_vm1, %v5839_v58 }
 0x116   : > { %4852 = vmatprep.mubr.msk.f32.mxu1 %vm203_vm1, %v6093_v17  ;;  %5075 = vmatprep.mubr.msk.f32.mxu0 %vm203_vm1, %v5843_v47 }
 0x119   : > { %4853 = vmatmul.mubr.msk.f32.gmra.mrb[24].mxu1 %vm203_vm1, %v6103_v11  ;;  %5076 = vmatmul.mubr.msk.f32.gmra.mrb[6].mxu0 %vm203_vm1, %v5855_v45  ;;  %v3370_v11 = vld [vmem:[#allocation2 + $0x1a2] sm:$0xff] }
 0x11a   : > { %4855 = vmatprep.mubr.msk.f32.mxu1 %vm203_vm1, %v6105_v12  ;;  %5078 = vmatprep.mubr.msk.f32.mxu0 %vm203_vm1, %v5859_v42 }
 0x11d   : > { %4856 = vmatmul.mubr.msk.f32.gmra.mrb[26].mxu1 %vm203_vm1, %v6115_v38  ;;  %5079 = vmatmul.mubr.msk.f32.gmra.mrb[8].mxu0 %vm203_vm1, %v5871_v39 }
 0x11e   : > { %4858 = vmatprep.mubr.msk.f32.mxu1 %vm203_vm1, %v6117_v6  ;;  %5081 = vmatprep.mubr.msk.f32.mxu0 %vm203_vm1, %v5875_v29  ;;  %v3369_v6 = vld [vmem:[#allocation2 + $0x19a] sm:$0xff] }
 0x121   : > { %4859 = vmatmul.mubr.msk.f32.gmra.mrb[28].mxu1 %vm203_vm1, %v6127_v57  ;;  %5082 = vmatmul.mubr.msk.f32.gmra.mrb[10].mxu0 %vm203_vm1, %v5887_v27 }
 0x122   : > { %4861 = vmatprep.mubr.msk.f32.mxu1 %vm203_vm1, %v6187_v20  ;;  %5084 = vmatprep.mubr.msk.f32.mxu0 %vm203_vm1, %v5889_v25 }
 0x125   : > { %4862 = vmatmul.mubr.msk.f32.gmra.mrb[30].mxu1 %vm203_vm1, %v6197_v44  ;;  %5085 = vmatmul.mubr.msk.f32.gmra.mrb[12].mxu0 %vm203_vm1, %v5898_v23 }
 0x126   : > { %4890 = vmatprep.mubr.msk.f32.mxu1 %vm203_vm1, %v6830_v36  ;;  %5087 = vmatprep.mubr.msk.f32.mxu0 %vm203_vm1, %v5902_v21 }
 0x129   : > { %4891 = vmatmul.mubr.msk.f32.vlgmr.msra.gmra.mrb[16].mxu1 %vm203_vm1, %v6832_v41  ;;  %5088 = vmatmul.mubr.msk.f32.gmra.mrb[14].mxu0 %vm203_vm1, %v5918_v19 }
 0x12a   : > { %4893 = vmatprep.mubr.msk.f32.mxu1 %vm203_vm1, %v6834_v48  ;;  %5090 = vmatprep.mubr.msk.f32.mxu0 %vm203_vm1, %v5924_v24 }
 0x12d   : > { %4894 = vmatmul.mubr.msk.f32.gmra.mrb[18].mxu1 %vm203_vm1, %v6836_v50  ;;  %5091 = vmatmul.mubr.msk.f32.gmra.mrb[16].mxu0 %vm203_vm1, %v5938_v8 }
 0x12e   : > { %4896 = vmatprep.mubr.msk.f32.mxu1 %vm203_vm1, %v6838_v52  ;;  %5093 = vmatprep.mubr.msk.f32.mxu0 %vm203_vm1, %v5942_v15 }
 0x131   : > { %4897 = vmatmul.mubr.msk.f32.gmra.mrb[20].mxu1 %vm203_vm1, %v6840_v0  ;;  %5094 = vmatmul.mubr.msk.f32.gmra.mrb[18].mxu0 %vm203_vm1, %v5954_v13 }
 0x132   : > { %4899 = vmatprep.mubr.msk.f32.mxu1 %vm203_vm1, %v6842_v2  ;;  %5096 = vmatprep.mubr.msk.f32.mxu0 %vm203_vm1, %v5958_v7  ;;  %v6857_v7 = vld [vmem:[#allocation65_spill] sm:$0xff] }
 0x135   : > { %4900 = vmatmul.mubr.msk.f32.gmra.mrb[22].mxu1 %vm203_vm1, %v6844_v60  ;;  %5097 = vmatmul.mubr.msk.f32.gmra.mrb[20].mxu0 %vm203_vm1, %v5970_v5  ;;  %v6856_v5 = vld [vmem:[#allocation64_spill] sm:$0xff] }
 0x136   : > { %4902 = vmatprep.mubr.msk.f32.mxu1 %vm203_vm1, %v6846_v35  ;;  %5099 = vmatprep.mubr.msk.f32.mxu0 %vm203_vm1, %v5974_v28 }
 0x139   : > { %4903 = vmatmul.mubr.msk.f32.gmra.mrb[24].mxu1 %vm203_vm1, %v6848_v43  ;;  %5100 = vmatmul.mubr.msk.f32.gmra.mrb[22].mxu0 %vm203_vm1, %v5986_v40  ;;  %v6474_v40 = vld [vmem:[%s6683_s2] ss:$0 sm:$0xff] }
 0x13a   : > { %4905 = vmatprep.mubr.msk.f32.mxu1 %vm203_vm1, %v6850_v51  ;;  %5102 = vmatprep.mubr.msk.f32.mxu0 %vm203_vm1, %v5990_v46 }
 0x13d   : > { %4906 = vmatmul.mubr.msk.f32.gmra.mrb[26].mxu1 %vm203_vm1, %v6852_v3  ;;  %5103 = vmatmul.mubr.msk.f32.gmra.mrb[24].mxu0 %vm203_vm1, %v6002_v33 }
 0x13e   : > { %4908 = vmatprep.mubr.msk.f32.mxu1 %vm203_vm1, %v6853_v55  ;;  %5105 = vmatprep.mubr.msk.f32.mxu0 %vm203_vm1, %v6006_v9 }
 0x141   : > { %4909 = vmatmul.mubr.msk.f32.gmra.mrb[28].mxu1 %vm203_vm1, %v6855_v49  ;;  %5106 = vmatmul.mubr.msk.f32.gmra.mrb[26].mxu0 %vm203_vm1, %v6827_v32 }
 0x142   : > { %4911 = vmatprep.mubr.msk.f32.mxu1 %vm203_vm1, %v6321_v34  ;;  %5108 = vmatprep.mubr.msk.f32.mxu0 %vm203_vm1, %v6856_v5 }
 0x145   : > { %4912 = vmatmul.mubr.msk.f32.gmra.mrb[30].mxu1 %vm203_vm1, %v6331_v53  ;;  %5109 = vmatmul.mubr.msk.f32.gmra.mrb[28].mxu0 %vm203_vm1, %v6857_v7 }
 0x146   : > { %5111 = vmatprep.mubr.msk.f32.mxu0 %vm203_vm1, %v3369_v6 }
 0x149   : > { %5112 = vmatmul.mubr.msk.f32.gmra.mrb[30].mxu0 %vm203_vm1, %v3370_v11 }
 0x1bc   : > { %v4818_v12 = vpop.f32.mrb[0].mxu1 }
 0x1bd   : > { %v1587_v13 = vpop.f32.mrb[1].mxu1 }
 0x1c0   : > { %v4821_v14 = vpop.f32.mrb[2].mxu1 }
 0x1c1   : > { %v1597_v15 = vpop.f32.mrb[3].mxu1 }
 0x1c4   : > { %v4824_v16 = vpop.f32.mrb[4].mxu1 }
 0x1c5   : > { %v1607_v17 = vpop.f32.mrb[5].mxu1 }
 0x1c8   : > { %v4827_v18 = vpop.f32.mrb[6].mxu1 }
 0x1c9   : > { %v1617_v19 = vpop.f32.mrb[7].mxu1 }
 0x1cc   : > { %v4830_v21 = vpop.f32.mrb[8].mxu1 }
 0x1cd   : > { %v1627_v22 = vpop.f32.mrb[9].mxu1 }
 0x1d0   : > { %v4833_v23 = vpop.f32.mrb[10].mxu1 }
 0x1d1   : > { %v1637_v25 = vpop.f32.mrb[11].mxu1 }
 0x1d4   : > { %v4836_v27 = vpop.f32.mrb[12].mxu1 }
 0x1d5   : > { %v6465_v28 = vpop.f32.mrb[13].mxu1 }
 0x1d8   : > { %v6467_v29 = vpop.f32.mrb[14].mxu1 }
 0x1d9   : > { %v6469_v38 = vpop.f32.mrb[15].mxu1 }
 0x1e0   : > { %v5068_v39 = vpop.f32.mrb[0].mxu0 }
 0x1e1   : > { %v5116_v42 = vadd.f32 %v5068_v39, %v4818_v12  ;;  %v3538_v45 = vpop.f32.mrb[1].mxu0 }
 0x1e2   : > { %v5117_v46 = vadd.f32 %v3538_v45, %v1587_v13 }
 0x1e3   : > { %v3737_v47 = vadd.f32 %v5116_v42, %v6474_v40 }
 0x1e4   : > { %v5071_v54 = vpop.f32.mrb[2].mxu0  ;;  %v3736_v56 = vadd.f32 %v5117_v46, %v6474_v40 }
 0x1e5   : > { %v5118_v57 = vadd.f32 %v5071_v54, %v4821_v14  ;;  %v3548_v58 = vpop.f32.mrb[3].mxu0  ;;  %v3769_v59 = vmax.f32 %v3737_v47, 0.0 }
 0x1e6   : > { %v5119_v61 = vadd.f32 %v3548_v58, %v1597_v15  ;;  %v3768_v4 = vmax.f32 %v3736_v56, 0.0 }
 0x1e7   : > { %3834 = vrot.lane.b32.xlu0 %v3769_v59, %s5391_s14  ;;  %v3739_v62 = vadd.f32 %v5118_v57, %v6474_v40 }
 0x1e8   : > { %v5074_v1 = vpop.f32.mrb[4].mxu0  ;;  %v3738_v9 = vadd.f32 %v5119_v61, %v6474_v40 }
 0x1e9   : > { %v5120_v10 = vadd.f32 %v5074_v1, %v4824_v16  ;;  %v3558_v31 = vpop.f32.mrb[5].mxu0  ;;  %v3771_v33 = vmax.f32 %v3739_v62, 0.0 }
 0x1ea   : > { %v5121_v26 = vadd.f32 %v3558_v31, %v1607_v17  ;;  %v3770_v63 = vmax.f32 %v3738_v9, 0.0 }
 0x1eb   : > { %3832 = vrot.lane.b32.xlu0 %v3768_v4, %s5391_s14  ;;  %3838 = vrot.lane.b32.xlu1 %v3771_v33, %s5391_s14  ;;  %v3741_v20 = vadd.f32 %v5120_v10, %v6474_v40 }
 0x1ec   : > { %v3740_v24 = vadd.f32 %v5121_v26, %v6474_v40  ;;  %v5077_v8 = vpop.f32.mrb[6].mxu0 }
 0x1ed   : > { %v5122_v44 = vadd.f32 %v5077_v8, %v4827_v18  ;;  %v3568_v32 = vpop.f32.mrb[7].mxu0  ;;  %v3773_v52 = vmax.f32 %v3741_v20, 0.0 }
 0x1ee   : > { %v3772_v36 = vmax.f32 %v3740_v24, 0.0  ;;  %v5123_v41 = vadd.f32 %v3568_v32, %v1617_v19 }
 0x1ef   : > { %3836 = vrot.lane.b32.xlu1 %v3770_v63, %s5391_s14  ;;  %v3743_v0 = vadd.f32 %v5122_v44, %v6474_v40 }
 0x1f0   : > { %v3742_v48 = vadd.f32 %v5123_v41, %v6474_v40  ;;  %v5080_v50 = vpop.f32.mrb[8].mxu0  ;;  %3840 = vrot.lane.b32.xlu0 %v3772_v36, %s5391_s14 }
 0x1f1   : > { %v5124_v2 = vadd.f32 %v5080_v50, %v4830_v21  ;;  %v3578_v60 = vpop.f32.mrb[9].mxu0  ;;  %v3775_v55 = vmax.f32 %v3743_v0, 0.0 }
 0x1f2   : > { %v3774_v35 = vmax.f32 %v3742_v48, 0.0  ;;  %v5125_v43 = vadd.f32 %v3578_v60, %v1627_v22 }
 0x1f3   : > { %3842 = vrot.lane.b32.xlu1 %v3773_v52, %s5391_s14  ;;  %v3745_v34 = vadd.f32 %v5124_v2, %v6474_v40 }
 0x1f4   : > { %v3744_v51 = vadd.f32 %v5125_v43, %v6474_v40  ;;  %v5083_v3 = vpop.f32.mrb[10].mxu0  ;;  %3844 = vrot.lane.b32.xlu0 %v3774_v35, %s5391_s14 }
 0x1f5   : > { %v5126_v49 = vadd.f32 %v5083_v3, %v4833_v23  ;;  %v3588_v53 = vpop.f32.mrb[11].mxu0  ;;  %v3777_v7 = vmax.f32 %v3745_v34, 0.0 }
 0x1f6   : > { %v3776_v30 = vmax.f32 %v3744_v51, 0.0  ;;  %v5127_v37 = vadd.f32 %v3588_v53, %v1637_v25 }
 0x1f7   : > { %3846 = vrot.lane.b32.xlu1 %v3775_v55, %s5391_s14  ;;  %v3747_v11 = vadd.f32 %v5126_v49, %v6474_v40 }
 0x1f8   : > { %v3746_v5 = vadd.f32 %v5127_v37, %v6474_v40  ;;  %v5086_v6 = vpop.f32.mrb[12].mxu0  ;;  %3848 = vrot.lane.b32.xlu0 %v3776_v30, %s5391_s14 }
 0x1f9   : > { %v5128_v12 = vadd.f32 %v5086_v6, %v4836_v27  ;;  %v3598_v13 = vpop.f32.mrb[13].mxu0  ;;  %v3779_v19 = vmax.f32 %v3747_v11, 0.0 }
 0x1fa   : > { %v3778_v14 = vmax.f32 %v3746_v5, 0.0  ;;  %v5129_v15 = vadd.f32 %v3598_v13, %v6465_v28 }
 0x1fb   : > { %3850 = vrot.lane.b32.xlu1 %v3777_v7, %s5391_s14  ;;  %v3749_v21 = vadd.f32 %v5128_v12, %v6474_v40 }
 0x1fc   : > { %v3748_v16 = vadd.f32 %v5129_v15, %v6474_v40  ;;  %v5089_v17 = vpop.f32.mrb[14].mxu0  ;;  %3852 = vrot.lane.b32.xlu0 %v3778_v14, %s5391_s14  ;;  %v4892_v18 = vpop.f32.mrb[16].mxu1 }
 0x1fd   : > { %v5130_v22 = vadd.f32 %v5089_v17, %v6467_v29  ;;  %v2057_v23 = vpop.f32.mrb[17].mxu1  ;;  %v3608_v25 = vpop.f32.mrb[15].mxu0  ;;  %v3781_v46 = vmax.f32 %v3749_v21, 0.0 }
 0x1fe   : > { %v3780_v27 = vmax.f32 %v3748_v16, 0.0  ;;  %v5131_v39 = vadd.f32 %v3608_v25, %v6469_v38 }
 0x1ff   : > { %3854 = vrot.lane.b32.xlu1 %v3779_v19, %s5391_s14  ;;  %v3751_v47 = vadd.f32 %v5130_v22, %v6474_v40 }
 0x200   : > { %v3750_v28 = vadd.f32 %v5131_v39, %v6474_v40  ;;  %v5092_v42 = vpop.f32.mrb[16].mxu0  ;;  %3856 = vrot.lane.b32.xlu0 %v3780_v27, %s5391_s14  ;;  %v4895_v45 = vpop.f32.mrb[18].mxu1 }
 0x201   : > { %v5132_v54 = vadd.f32 %v5092_v42, %v4892_v18  ;;  %v2067_v56 = vpop.f32.mrb[19].mxu1  ;;  %v3618_v57 = vpop.f32.mrb[17].mxu0  ;;  %v3783_v62 = vmax.f32 %v3751_v47, 0.0 }
 0x202   : > { %v3782_v29 = vmax.f32 %v3750_v28, 0.0  ;;  %v5133_v58 = vadd.f32 %v3618_v57, %v2057_v23 }
 0x203   : > { %3858 = vrot.lane.b32.xlu1 %v3781_v46, %s5391_s14  ;;  %v3753_v1 = vadd.f32 %v5132_v54, %v6474_v40 }
 0x204   : > { %v3752_v38 = vadd.f32 %v5133_v58, %v6474_v40  ;;  %v5095_v59 = vpop.f32.mrb[18].mxu0  ;;  %3860 = vrot.lane.b32.xlu0 %v3782_v29, %s5391_s14  ;;  %v4898_v61 = vpop.f32.mrb[20].mxu1 }
 0x205   : > { %v5134_v4 = vadd.f32 %v5095_v59, %v4895_v45  ;;  %v2077_v9 = vpop.f32.mrb[21].mxu1  ;;  %v3628_v10 = vpop.f32.mrb[19].mxu0  ;;  %v3785_v63 = vmax.f32 %v3753_v1, 0.0 }
 0x206   : > { %v3784_v31 = vmax.f32 %v3752_v38, 0.0  ;;  %v5135_v33 = vadd.f32 %v3628_v10, %v2067_v56 }
 0x207   : > { %3862 = vrot.lane.b32.xlu1 %v3783_v62, %s5391_s14  ;;  %v3755_v20 = vadd.f32 %v5134_v4, %v6474_v40 }
 0x208   : > { %v3754_v26 = vadd.f32 %v5135_v33, %v6474_v40  ;;  %v5098_v24 = vpop.f32.mrb[20].mxu0  ;;  %3864 = vrot.lane.b32.xlu0 %v3784_v31, %s5391_s14  ;;  %v4901_v8 = vpop.f32.mrb[22].mxu1 }
 0x209   : > { %v5136_v44 = vadd.f32 %v5098_v24, %v4898_v61  ;;  %v2087_v32 = vpop.f32.mrb[23].mxu1  ;;  %v3638_v36 = vpop.f32.mrb[21].mxu0  ;;  %v3787_v2 = vmax.f32 %v3755_v20, 0.0  ;;  %v6859_v20 = vld [vmem:[#allocation3_spill] sm:$0xff] }
 0x20a   : > { %v3786_v41 = vmax.f32 %v3754_v26, 0.0  ;;  %v5137_v48 = vadd.f32 %v3638_v36, %v2077_v9  ;;  %v6858_v26 = vld [vmem:[#allocation4_spill] sm:$0xff] }
 0x20b   : > { %3866 = vrot.lane.b32.xlu1 %v3785_v63, %s5391_s14  ;;  %v3757_v60 = vadd.f32 %v5136_v44, %v6474_v40 }
 0x20c   : > { %v3756_v50 = vadd.f32 %v5137_v48, %v6474_v40  ;;  %v5101_v52 = vpop.f32.mrb[22].mxu0  ;;  %3868 = vrot.lane.b32.xlu0 %v3786_v41, %s5391_s14  ;;  %v4904_v0 = vpop.f32.mrb[24].mxu1  ;;  %v6861_v48 = vld [vmem:[#allocation5_spill] sm:$0xff] }
 0x20d   : > { %v5138_v35 = vadd.f32 %v5101_v52, %v4901_v8  ;;  %v2097_v43 = vpop.f32.mrb[25].mxu1  ;;  %v3648_v51 = vpop.f32.mrb[23].mxu0  ;;  %v3789_v30 = vmax.f32 %v3757_v60, 0.0 }
 0x20e   : > { %v3788_v3 = vmax.f32 %v3756_v50, 0.0  ;;  %v5139_v55 = vadd.f32 %v3648_v51, %v2087_v32  ;;  %v6860_v32 = vld [vmem:[#allocation6_spill] sm:$0xff] }
 0x20f   : > { %3870 = vrot.lane.b32.xlu1 %v3787_v2, %s5391_s14  ;;  %v3759_v37 = vadd.f32 %v5138_v35, %v6474_v40  ;;  %v6863_v35 = vld [vmem:[#allocation8_spill] sm:$0xff] }
 0x210   : > { %v3758_v34 = vadd.f32 %v5139_v55, %v6474_v40  ;;  %v5104_v49 = vpop.f32.mrb[24].mxu0  ;;  %3872 = vrot.lane.b32.xlu0 %v3788_v3, %s5391_s14  ;;  %v4907_v53 = vpop.f32.mrb[26].mxu1  ;;  %v6864_v3 = vld [vmem:[#allocation9_spill] sm:$0xff] }
 0x211   : > { %v5140_v5 = vadd.f32 %v5104_v49, %v4904_v0  ;;  %v2107_v6 = vpop.f32.mrb[27].mxu1  ;;  %v3658_v7 = vpop.f32.mrb[25].mxu0  ;;  %v3791_v16 = vmax.f32 %v3759_v37, 0.0  ;;  %v6862_v0 = vld [vmem:[#allocation7_spill] sm:$0xff]  ;;  %v6865_v49 = vld [vmem:[#allocation10_spill] sm:$0xff] }
 0x212   : > { %v3790_v11 = vmax.f32 %v3758_v34, 0.0  ;;  %v5141_v12 = vadd.f32 %v3658_v7, %v2097_v43  ;;  %v6866_v37 = vld [vmem:[#allocation11_spill] sm:$0xff]  ;;  %v6867_v7 = vld [vmem:[#allocation12_spill] sm:$0xff] }
 0x213   : > { %3874 = vrot.lane.b32.xlu1 %v3789_v30, %s5391_s14  ;;  %v3761_v17 = vadd.f32 %v5140_v5, %v6474_v40 }
 0x214   : > { %v3760_v13 = vadd.f32 %v5141_v12, %v6474_v40  ;;  %v5107_v14 = vpop.f32.mrb[26].mxu0  ;;  %3876 = vrot.lane.b32.xlu0 %v3790_v11, %s5391_s14  ;;  %v4910_v15 = vpop.f32.mrb[28].mxu1 }
 0x215   : > { %v5142_v18 = vadd.f32 %v5107_v14, %v4907_v53  ;;  %v2117_v19 = vpop.f32.mrb[29].mxu1  ;;  %v3668_v21 = vpop.f32.mrb[27].mxu0  ;;  %v3793_v28 = vmax.f32 %v3761_v17, 0.0 }
 0x216   : > { %v3792_v22 = vmax.f32 %v3760_v13, 0.0  ;;  %v5143_v23 = vadd.f32 %v3668_v21, %v2107_v6  ;;  %v6868_v13 = vld [vmem:[#allocation13_spill] sm:$0xff] }
 0x217   : > { %3878 = vrot.lane.b32.xlu1 %v3791_v16, %s5391_s14  ;;  %v3763_v42 = vadd.f32 %v5142_v18, %v6474_v40  ;;  %v6869_v16 = vld [vmem:[#allocation14_spill] sm:$0xff] }
 0x218   : > { %v3762_v25 = vadd.f32 %v5143_v23, %v6474_v40  ;;  %v5110_v27 = vpop.f32.mrb[28].mxu0  ;;  %3880 = vrot.lane.b32.xlu0 %v3792_v22, %s5391_s14  ;;  %v4913_v39 = vpop.f32.mrb[30].mxu1  ;;  %v6871_v23 = vld [vmem:[#allocation16_spill] sm:$0xff] }
 0x219   : > { %v5144_v45 = vadd.f32 %v5110_v27, %v4910_v15  ;;  %v2127_v46 = vpop.f32.mrb[31].mxu1  ;;  %v3678_v47 = vpop.f32.mrb[29].mxu0  ;;  %v3795_v58 = vmax.f32 %v3763_v42, 0.0 }
 0x21a   : > { %v3794_v54 = vmax.f32 %v3762_v25, 0.0  ;;  %v5145_v56 = vadd.f32 %v3678_v47, %v2117_v19  ;;  %v6870_v19 = vld [vmem:[#allocation15_spill] sm:$0xff] }
 0x21b   : > { %3882 = vrot.lane.b32.xlu1 %v3793_v28, %s5391_s14  ;;  %v3765_v38 = vadd.f32 %v5144_v45, %v6474_v40  ;;  %v6873_v45 = vld [vmem:[#allocation18_spill] sm:$0xff] }
 0x21c   : > { %v3764_v57 = vadd.f32 %v5145_v56, %v6474_v40  ;;  %v5113_v29 = vpop.f32.mrb[30].mxu0  ;;  %3884 = vrot.lane.b32.xlu0 %v3794_v54, %s5391_s14  ;;  %v6874_v54 = vld [vmem:[#allocation19_spill] sm:$0xff] }
 0x21d   : > { %v5146_v59 = vadd.f32 %v5113_v29, %v4913_v39  ;;  %v3688_v61 = vpop.f32.mrb[31].mxu0  ;;  %v3797_v10 = vmax.f32 %v3765_v38, 0.0  ;;  %v6872_v39 = vld [vmem:[#allocation17_spill] sm:$0xff]  ;;  %v6875_v29 = vld [vmem:[#allocation20_spill] sm:$0xff] }
 0x21e   : > { %v3796_v62 = vmax.f32 %v3764_v57, 0.0  ;;  %v5147_v1 = vadd.f32 %v3688_v61, %v2127_v46 }
 0x21f   : > { %v3767_v4 = vadd.f32 %v5146_v59, %v6474_v40  ;;  %3886 = vrot.lane.b32.xlu1 %v3795_v58, %s5391_s14  ;;  %v6876_v59 = vld [vmem:[#allocation21_spill] sm:$0xff] }
 0x220   : > { %v3766_v9 = vadd.f32 %v5147_v1, %v6474_v40  ;;  %3888 = vrot.lane.b32.xlu0 %v3796_v62, %s5391_s14  ;;  %v6877_v1 = vld [vmem:[#allocation22_spill] sm:$0xff] }
 0x221   : > { %v3799_v33 = vmax.f32 %v3767_v4, 0.0 }
 0x222   : > { %v3798_v31 = vmax.f32 %v3766_v9, 0.0 }
 0x223   : > { %3890 = vrot.lane.b32.xlu1 %v3797_v10, %s5391_s14  ;;  %v6878_v10 = vld [vmem:[#allocation23_spill] sm:$0xff] }
 0x224   : > { %3892 = vrot.lane.b32.xlu0 %v3798_v31, %s5391_s14 }
 0x227   : > { %3894 = vrot.lane.b32.xlu1 %v3799_v33, %s5391_s14 }
 0x259   : > { %v3835_v40 = vpop.permute.xlu0 %3834 }
 0x25a   : > { %v3929_v24 = vsel %vm203_vm1, %v6858_v26, %v3835_v40  ;;  %v6879_v40 = vld [vmem:[#allocation24_spill] sm:$0xff] }
 0x25b   : > { %3962 = vst.msk [vmem:[%s6548_s17 + $0x8] sm:$0xff] %vm3960_vm4, %v3929_v24 }
 0x25d   : > { %v3833_v8 = vpop.permute.xlu0 %3832  ;;  %v3839_v63 = vpop.permute.xlu1 %3838 }
 0x25e   : > { %v3928_v44 = vsel %vm203_vm1, %v6859_v20, %v3833_v8  ;;  %v3931_v36 = vsel %vm203_vm1, %v6860_v32, %v3839_v63  ;;  %v6880_v8 = vld [vmem:[#allocation25_spill] sm:$0xff] }
 0x25f   : > { %3961 = vst.msk [vmem:[%s6548_s17] sm:$0xff] %vm3960_vm4, %v3928_v44  ;;  %3964 = vst.msk [vmem:[%s6548_s17 + $0x18] sm:$0xff] %vm3960_vm4, %v3931_v36  ;;  %v6881_v44 = vld [vmem:[#allocation26_spill] sm:$0xff] }
 0x261   : > { %v3837_v41 = vpop.permute.xlu1 %3836 }
 0x262   : > { %v3930_v50 = vsel %vm203_vm1, %v6861_v48, %v3837_v41  ;;  %v3841_v52 = vpop.permute.xlu0 %3840  ;;  %v6882_v41 = vld [vmem:[#allocation27_spill] sm:$0xff] }
 0x263   : > { %3963 = vst.msk [vmem:[%s6548_s17 + $0x10] sm:$0xff] %vm3960_vm4, %v3930_v50  ;;  %v3932_v2 = vsel %vm203_vm1, %v6862_v0, %v3841_v52  ;;  %v6883_v52 = vld [vmem:[#allocation28_spill] sm:$0xff] }
 0x264   : > { %3965 = vst.msk [vmem:[%s6548_s17 + $0x20] sm:$0xff] %vm3960_vm4, %v3932_v2 }
 0x265   : > { %v3843_v60 = vpop.permute.xlu1 %3842 }
 0x266   : > { %v3933_v43 = vsel %vm203_vm1, %v6863_v35, %v3843_v60  ;;  %v3845_v51 = vpop.permute.xlu0 %3844  ;;  %v6884_v60 = vld [vmem:[#allocation29_spill] sm:$0xff] }
 0x267   : > { %3966 = vst.msk [vmem:[%s6548_s17 + $0x28] sm:$0xff] %vm3960_vm4, %v3933_v43  ;;  %v3934_v55 = vsel %vm203_vm1, %v6864_v3, %v3845_v51  ;;  %v6885_v51 = vld [vmem:[#allocation30_spill] sm:$0xff] }
 0x268   : > { %3967 = vst.msk [vmem:[%s6548_s17 + $0x30] sm:$0xff] %vm3960_vm4, %v3934_v55 }
 0x269   : > { %v3847_v34 = vpop.permute.xlu1 %3846 }
 0x26a   : > { %v3935_v53 = vsel %vm203_vm1, %v6865_v49, %v3847_v34  ;;  %v3849_v30 = vpop.permute.xlu0 %3848  ;;  %v6886_v34 = vld [vmem:[#allocation31_spill] sm:$0xff] }
 0x26b   : > { %3968 = vst.msk [vmem:[%s6548_s17 + $0x38] sm:$0xff] %vm3960_vm4, %v3935_v53  ;;  %v3936_v5 = vsel %vm203_vm1, %v6866_v37, %v3849_v30  ;;  %v6887_v30 = vld [vmem:[#allocation32_spill] sm:$0xff] }
 0x26c   : > { %3969 = vst.msk [vmem:[%s6548_s17 + $0x40] sm:$0xff] %vm3960_vm4, %v3936_v5 }
 0x26d   : > { %v3851_v6 = vpop.permute.xlu1 %3850 }
 0x26e   : > { %v3937_v11 = vsel %vm203_vm1, %v6867_v7, %v3851_v6  ;;  %v3853_v12 = vpop.permute.xlu0 %3852  ;;  %v6888_v6 = vld [vmem:[#allocation35_spill] sm:$0xff] }
 0x26f   : > { %3970 = vst.msk [vmem:[%s6548_s17 + $0x48] sm:$0xff] %vm3960_vm4, %v3937_v11  ;;  %v3938_v14 = vsel %vm203_vm1, %v6868_v13, %v3853_v12  ;;  %v6889_v12 = vld [vmem:[#allocation36_spill] sm:$0xff] }
 0x270   : > { %3971 = vst.msk [vmem:[%s6548_s17 + $0x50] sm:$0xff] %vm3960_vm4, %v3938_v14 }
 0x271   : > { %v3855_v15 = vpop.permute.xlu1 %3854 }
 0x272   : > { %v3939_v17 = vsel %vm203_vm1, %v6869_v16, %v3855_v15  ;;  %v3857_v18 = vpop.permute.xlu0 %3856 }
 0x273   : > { %3972 = vst.msk [vmem:[%s6548_s17 + $0x58] sm:$0xff] %vm3960_vm4, %v3939_v17  ;;  %v3940_v21 = vsel %vm203_vm1, %v6870_v19, %v3857_v18 }
 0x274   : > { %3973 = vst.msk [vmem:[%s6548_s17 + $0x60] sm:$0xff] %vm3960_vm4, %v3940_v21 }
 0x275   : > { %v3859_v22 = vpop.permute.xlu1 %3858 }
 0x276   : > { %v3941_v25 = vsel %vm203_vm1, %v6871_v23, %v3859_v22  ;;  %v3861_v27 = vpop.permute.xlu0 %3860 }
 0x277   : > { %3974 = vst.msk [vmem:[%s6548_s17 + $0x68] sm:$0xff] %vm3960_vm4, %v3941_v25  ;;  %v3942_v28 = vsel %vm203_vm1, %v6872_v39, %v3861_v27 }
 0x278   : > { %3975 = vst.msk [vmem:[%s6548_s17 + $0x70] sm:$0xff] %vm3960_vm4, %v3942_v28 }
 0x279   : > { %v3863_v42 = vpop.permute.xlu1 %3862 }
 0x27a   : > { %v3943_v46 = vsel %vm203_vm1, %v6873_v45, %v3863_v42  ;;  %v3865_v47 = vpop.permute.xlu0 %3864 }
 0x27b   : > { %3976 = vst.msk [vmem:[%s6548_s17 + $0x78] sm:$0xff] %vm3960_vm4, %v3943_v46  ;;  %v3944_v56 = vsel %vm203_vm1, %v6874_v54, %v3865_v47 }
 0x27c   : > { %3977 = vst.msk [vmem:[%s6548_s17 + $0x80] sm:$0xff] %vm3960_vm4, %v3944_v56 }
 0x27d   : > { %v3867_v57 = vpop.permute.xlu1 %3866 }
 0x27e   : > { %v3945_v58 = vsel %vm203_vm1, %v6875_v29, %v3867_v57  ;;  %v3869_v38 = vpop.permute.xlu0 %3868 }
 0x27f   : > { %3978 = vst.msk [vmem:[%s6548_s17 + $0x88] sm:$0xff] %vm3960_vm4, %v3945_v58  ;;  %v3946_v61 = vsel %vm203_vm1, %v6876_v59, %v3869_v38 }
 0x280   : > { %3979 = vst.msk [vmem:[%s6548_s17 + $0x90] sm:$0xff] %vm3960_vm4, %v3946_v61 }
 0x281   : > { %v3871_v62 = vpop.permute.xlu1 %3870 }
 0x282   : > { %v3947_v4 = vsel %vm203_vm1, %v6877_v1, %v3871_v62  ;;  %v3873_v9 = vpop.permute.xlu0 %3872 }
 0x283   : > { %3980 = vst.msk [vmem:[%s6548_s17 + $0x98] sm:$0xff] %vm3960_vm4, %v3947_v4  ;;  %v3948_v31 = vsel %vm203_vm1, %v6878_v10, %v3873_v9 }
 0x284   : > { %3981 = vst.msk [vmem:[%s6548_s17 + $0xa0] sm:$0xff] %vm3960_vm4, %v3948_v31 }
 0x285   : > { %v3875_v33 = vpop.permute.xlu1 %3874 }
 0x286   : > { %v3949_v26 = vsel %vm203_vm1, %v6879_v40, %v3875_v33  ;;  %v3877_v24 = vpop.permute.xlu0 %3876 }
 0x287   : > { %3982 = vst.msk [vmem:[%s6548_s17 + $0xa8] sm:$0xff] %vm3960_vm4, %v3949_v26  ;;  %v3950_v63 = vsel %vm203_vm1, %v6880_v8, %v3877_v24 }
 0x288   : > { %3983 = vst.msk [vmem:[%s6548_s17 + $0xb0] sm:$0xff] %vm3960_vm4, %v3950_v63 }
 0x289   : > { %v3879_v20 = vpop.permute.xlu1 %3878 }
 0x28a   : > { %v3951_v32 = vsel %vm203_vm1, %v6881_v44, %v3879_v20  ;;  %v3881_v36 = vpop.permute.xlu0 %3880 }
 0x28b   : > { %3984 = vst.msk [vmem:[%s6548_s17 + $0xb8] sm:$0xff] %vm3960_vm4, %v3951_v32  ;;  %v3952_v48 = vsel %vm203_vm1, %v6882_v41, %v3881_v36 }
 0x28c   : > { %3985 = vst.msk [vmem:[%s6548_s17 + $0xc0] sm:$0xff] %vm3960_vm4, %v3952_v48 }
 0x28d   : > { %v3883_v50 = vpop.permute.xlu1 %3882 }
 0x28e   : > { %v3953_v0 = vsel %vm203_vm1, %v6883_v52, %v3883_v50  ;;  %v3885_v2 = vpop.permute.xlu0 %3884 }
 0x28f   : > { %3986 = vst.msk [vmem:[%s6548_s17 + $0xc8] sm:$0xff] %vm3960_vm4, %v3953_v0  ;;  %v3954_v35 = vsel %vm203_vm1, %v6884_v60, %v3885_v2 }
 0x290   : > { %3987 = vst.msk [vmem:[%s6548_s17 + $0xd0] sm:$0xff] %vm3960_vm4, %v3954_v35 }
 0x291   : > { %v3887_v43 = vpop.permute.xlu1 %3886 }
 0x292   : > { %v3955_v3 = vsel %vm203_vm1, %v6885_v51, %v3887_v43  ;;  %v3889_v55 = vpop.permute.xlu0 %3888 }
 0x293   : > { %3988 = vst.msk [vmem:[%s6548_s17 + $0xd8] sm:$0xff] %vm3960_vm4, %v3955_v3  ;;  %v3956_v49 = vsel %vm203_vm1, %v6886_v34, %v3889_v55 }
 0x294   : > { %3989 = vst.msk [vmem:[%s6548_s17 + $0xe0] sm:$0xff] %vm3960_vm4, %v3956_v49 }
 0x295   : > { %v3891_v53 = vpop.permute.xlu1 %3890 }
 0x296   : > { %v3957_v37 = vsel %vm203_vm1, %v6887_v30, %v3891_v53  ;;  %v3893_v5 = vpop.permute.xlu0 %3892 }
 0x297   : > { %3990 = vst.msk [vmem:[%s6548_s17 + $0xe8] sm:$0xff] %vm3960_vm4, %v3957_v37  ;;  %v3958_v7 = vsel %vm203_vm1, %v6888_v6, %v3893_v5 }
 0x298   : > { %3991 = vst.msk [vmem:[%s6548_s17 + $0xf0] sm:$0xff] %vm3960_vm4, %v3958_v7 }
 0x299   : > { %v3895_v11 = vpop.permute.xlu1 %3894 }
 0x29a   : > { %v3959_v13 = vsel %vm203_vm1, %v6889_v12, %v3895_v11 }
 0x29b   : > { %3992 = vst.msk [vmem:[%s6548_s17 + $0xf8] sm:$0xff] %vm3960_vm4, %v3959_v13 }
 0x29c PF: > { %s13_s12 = sadd.s32 1, %s5388_s12  }
 0x29d   : > { %p10_p4 = scmp.ge.s32.totalorder %s13_s12, 4  }
 0x29f   :  { %12 = sbr.rel (!%p10_p4) target bundleno = 1 (0x1), region = 73 }

</bundles_post_ra>
